<compile_context>
chip_gen: v5e
topology: v5e:2x2
jax: 0.10.0
libtpu: 0.0.40
codegen_flags: <defaults>
</compile_context>

<pallas_src>
import jax
import jax.numpy as jnp
from jax import lax
from jax.experimental import pallas as pl
from jax.experimental.pallas import tpu as pltpu


# ------------------------- fused LSTM(+Linear) kernel -------------------------

def _make_fused_kernel(T, B, D, H, L):
    """Kernel for fixed (T, B=padded batch, D, H, L).

    Ref order:
      inputs : x_tm (T,B,D), h0 (L,B,H), c0 (L,B,H), w_lin (1,H), b_lin (1,1),
               then per layer l: wih (D_in, 4H), whh (H, 4H), b (1, 4H)
      outputs: y (T,B), hT (L,B,H), cT (L,B,H)
      scratch: gx_sc (T,B,4H) hoisted layer-0 input projection,
               seq_sc (T,B,H) top-layer output sequence (for the Linear head).
    """
    G = 4 * H

    def kernel(*refs):
        x_ref, h0_ref, c0_ref, wlin_ref, blin_ref = refs[:5]
        layer_refs = refs[5:5 + 3 * L]
        y_ref, hT_ref, cT_ref = refs[5 + 3 * L:8 + 3 * L]
        gx_sc, seq_sc = refs[8 + 3 * L:]

        wih_refs = [layer_refs[3 * l + 0] for l in range(L)]
        whh_refs = [layer_refs[3 * l + 1] for l in range(L)]
        b_refs = [layer_refs[3 * l + 2] for l in range(L)]

        # ---- hoisted layer-0 input projection (off the serial path) ----------
        # gx0[t] = x[t] @ Wih0 + b0  for all timesteps in one MXU dot.
        x2d = x_ref[...].reshape(T * B, D)
        proj0 = (jnp.dot(x2d, wih_refs[0][...],
                         preferred_element_type=jnp.float32)
                 + b_refs[0][...])                               # (T*B, 4H)
        gx_sc[...] = proj0.reshape(T, B, G)                      # tile-aligned

        # ---- packed-gate activation constants (hoisted) -----------------------
        # sigmoid(x) = 0.5*(tanh(0.5x)+1) on i/f/o lanes, tanh(x) on g lanes.
        lane = lax.broadcasted_iota(jnp.int32, (1, G), 1)
        is_g = jnp.logical_and(lane >= 2 * H, lane < 3 * H)
        scale = jnp.where(is_g, 1.0, 0.5).astype(jnp.float32)    # pre == post scale
        offset = jnp.where(is_g, 0.0, 0.5).astype(jnp.float32)

        # Hoist all weights / biases out of the wavefront loop.
        whh = [whh_refs[l][...] for l in range(L)]
        wih = [wih_refs[l][...] for l in range(L)]
        bias = [b_refs[l][...] for l in range(L)]

        carries = [(h0_ref[l], c0_ref[l]) for l in range(L)]
        prev_h = [None] * L   # layer-l output produced at the previous wavefront step

        # ---- wavefront over layers: step s runs layer l at timestep t = s - l --
        for s in range(T + L - 1):
            new_h = list(prev_h)
            for l in range(L):
                t = s - l
                if not (0 <= t < T):
                    continue
                if l == 0:
                    gx = gx_sc[t]                                # (B, 4H) precomputed
                else:
                    # depends only on layer l-1's output from step s-1
                    gx = (jnp.dot(prev_h[l - 1], wih[l],
                                  preferred_element_type=jnp.float32)
                          + bias[l])
                h, c = carries[l]
                gates = gx + jnp.dot(h, whh[l],
                                     preferred_element_type=jnp.float32)  # (B, 4H)
                act = jnp.tanh(gates * scale) * scale + offset            # 1 EUP push
                i_ = act[:, 0 * H:1 * H]
                f_ = act[:, 1 * H:2 * H]
                g_ = act[:, 2 * H:3 * H]
                o_ = act[:, 3 * H:4 * H]
                c_new = f_ * c + i_ * g_
                h_new = o_ * jnp.tanh(c_new)
                carries[l] = (h_new, c_new)
                new_h[l] = h_new
                if l == L - 1:
                    seq_sc[t] = h_new
            prev_h = new_h

        for l in range(L):
            hT_ref[l] = carries[l][0]
            cT_ref[l] = carries[l][1]

        # ---- fused Linear(H, 1): VPU multiply + lane reduce, one store ---------
        y_all = seq_sc[...]                                      # (T, B, H)
        w = wlin_ref[...]                                        # (1, H)
        y = jnp.sum(y_all * w[None, :, :], axis=-1) + blin_ref[...]
        y_ref[...] = y                                           # (T, B)

    return kernel


# ------------------------------- module forward -------------------------------

def vestim_lstm_forward(params, x, h_s, h_c):
    """Matches VEstimLSTM.forward(x, h_s, h_c).

    x:   (B, T, input_size)  batch_first
    h_s: (layers, B, hidden)
    h_c: (layers, B, hidden)
    returns: y (B, T, 1), (h_s_out, h_c_out) each (layers, B, hidden)
    """
    B, T, D = x.shape
    L, _, H = h_s.shape
    BP = max(8, ((B + 7) // 8) * 8)                              # full sublane tile
    pad_b = BP - B

    x_tm = jnp.transpose(x, (1, 0, 2))                           # (T, B, D)
    x_tm = jnp.pad(x_tm, ((0, 0), (0, pad_b), (0, 0)))
    h0 = jnp.pad(h_s, ((0, 0), (0, pad_b), (0, 0)))
    c0 = jnp.pad(h_c, ((0, 0), (0, pad_b), (0, 0)))

    # Weight layout plumbing lives in the wrapper: packed (D_in,4H)/(H,4H)/(1,4H)
    # so the kernel never slices per-gate weights or re-broadcasts biases.
    layer_args = []
    for l in range(L):
        w_ih = params[f"w_ih_l{l}"]                              # (4H, d_in), gates i,f,g,o
        w_hh = params[f"w_hh_l{l}"]                              # (4H, H)
        b = (params[f"b_ih_l{l}"] + params[f"b_hh_l{l}"]).reshape(1, 4 * H)
        layer_args += [w_ih.T, w_hh.T, b]                        # (d_in,4H),(H,4H),(1,4H)

    w_lin = params["w_lin"]                                      # (1, H)
    b_lin = params["b_lin"].reshape(1, 1)                        # (1, 1)

    kernel = _make_fused_kernel(T, BP, D, H, L)
    y_tb, hT, cT = pl.pallas_call(
        kernel,
        out_shape=(
            jax.ShapeDtypeStruct((T, BP), jnp.float32),
            jax.ShapeDtypeStruct((L, BP, H), jnp.float32),
            jax.ShapeDtypeStruct((L, BP, H), jnp.float32),
        ),
        scratch_shapes=[
            pltpu.VMEM((T, BP, 4 * H), jnp.float32),             # packed gx (layer 0)
            pltpu.VMEM((T, BP, H), jnp.float32),                 # top-layer outputs
        ],
        compiler_params=pltpu.CompilerParams(
            vmem_limit_bytes=32 * 1024 * 1024),
    )(x_tm, h0, c0, w_lin, b_lin, *layer_args)

    y = jnp.transpose(y_tb[:, :B])[:, :, None]                   # (B, T, 1)
    return y, (hT[:, :B], cT[:, :B])


# ------------------------------ pure-JAX reference ----------------------------

def vestim_lstm_ref(params, x, h_s, h_c):
    layers, _, H = h_s.shape
    inp = x
    hs, cs = [], []
    for l in range(layers):
        w_ih = params[f"w_ih_l{l}"]
        w_hh = params[f"w_hh_l{l}"]
        b = params[f"b_ih_l{l}"] + params[f"b_hh_l{l}"]

        def step(carry, x_t, w_ih=w_ih, w_hh=w_hh, b=b):
            h, c = carry
            gates = x_t @ w_ih.T + h @ w_hh.T + b
            i, f, g, o = jnp.split(gates, 4, axis=-1)
            i = jax.nn.sigmoid(i)
            f = jax.nn.sigmoid(f)
            g = jnp.tanh(g)
            o = jax.nn.sigmoid(o)
            c = f * c + i * g
            h = o * jnp.tanh(c)
            return (h, c), h

        (hT, cT), ys = lax.scan(step, (h_s[l], h_c[l]),
                                jnp.transpose(inp, (1, 0, 2)))
        inp = jnp.transpose(ys, (1, 0, 2))
        hs.append(hT)
        cs.append(cT)
    y = inp @ params["w_lin"].T + params["b_lin"]
    return y, (jnp.stack(hs), jnp.stack(cs))


# ------------------------------------ main -------------------------------------

def init_params(key, input_size, hidden, layers):
    k = 1.0 / jnp.sqrt(hidden)
    params = {}
    for l in range(layers):
        d_in = input_size if l == 0 else hidden
        key, k1, k2, k3, k4 = jax.random.split(key, 5)
        params[f"w_ih_l{l}"] = jax.random.uniform(k1, (4 * hidden, d_in), jnp.float32, -k, k)
        params[f"w_hh_l{l}"] = jax.random.uniform(k2, (4 * hidden, hidden), jnp.float32, -k, k)
        params[f"b_ih_l{l}"] = jax.random.uniform(k3, (4 * hidden,), jnp.float32, -k, k)
        params[f"b_hh_l{l}"] = jax.random.uniform(k4, (4 * hidden,), jnp.float32, -k, k)
    key, k1, k2 = jax.random.split(key, 3)
    params["w_lin"] = jax.random.uniform(k1, (1, hidden), jnp.float32, -k, k)
    params["b_lin"] = jax.random.uniform(k2, (1,), jnp.float32, -k, k)
    return params


if __name__ == "__main__":
    B, T, INPUT, HIDDEN, LAYERS = 2, 8, 16, 32, 2

    key = jax.random.PRNGKey(0)
    key, kx, kh, kc = jax.random.split(key, 4)
    params = init_params(key, INPUT, HIDDEN, LAYERS)
    x = jax.random.normal(kx, (B, T, INPUT), jnp.float32)
    h_s = jax.random.normal(kh, (LAYERS, B, HIDDEN), jnp.float32)
    h_c = jax.random.normal(kc, (LAYERS, B, HIDDEN), jnp.float32)

    y, (hs_out, cs_out) = jax.jit(vestim_lstm_forward)(params, x, h_s, h_c)
    jax.block_until_ready((y, hs_out, cs_out))

    y_ref, (hs_ref, cs_ref) = jax.jit(vestim_lstm_ref)(params, x, h_s, h_c)
    jax.block_until_ready((y_ref, hs_ref, cs_ref))

    assert y.shape == (B, T, 1) and hs_out.shape == (LAYERS, B, HIDDEN)
    assert jnp.allclose(y, y_ref, atol=1e-2, rtol=1e-2)
    assert jnp.allclose(hs_out, hs_ref, atol=1e-2, rtol=1e-2)
    assert jnp.allclose(cs_out, cs_ref, atol=1e-2, rtol=1e-2)

    print("KERNEL_OK")
</pallas_src>

<mosaic_0001>
module attributes {stable_mosaic.version = 11 : i64} {
  func.func @kernel(%arg0: memref<8x8x16xf32, #tpu.memory_space<vmem>>, %arg1: memref<2x8x32xf32, #tpu.memory_space<vmem>>, %arg2: memref<2x8x32xf32, #tpu.memory_space<vmem>>, %arg3: memref<1x32xf32, #tpu.memory_space<vmem>>, %arg4: memref<1x1xf32, #tpu.memory_space<vmem>>, %arg5: memref<16x128xf32, #tpu.memory_space<vmem>>, %arg6: memref<32x128xf32, #tpu.memory_space<vmem>>, %arg7: memref<1x128xf32, #tpu.memory_space<vmem>>, %arg8: memref<32x128xf32, #tpu.memory_space<vmem>>, %arg9: memref<32x128xf32, #tpu.memory_space<vmem>>, %arg10: memref<1x128xf32, #tpu.memory_space<vmem>>, %arg11: memref<8x8xf32, #tpu.memory_space<vmem>>, %arg12: memref<2x8x32xf32, #tpu.memory_space<vmem>>, %arg13: memref<2x8x32xf32, #tpu.memory_space<vmem>>, %arg14: memref<8x8x128xf32, #tpu.memory_space<vmem>>, %arg15: memref<8x8x32xf32, #tpu.memory_space<vmem>>) attributes {dimension_semantics = [], scalar_prefetch = 0 : i64, scratch_operands = 2 : i64, tpu.core_type = #tpu.core_type<tc>} {
    %c0 = arith.constant 0 : index
    %c0_0 = arith.constant 0 : index
    %c0_1 = arith.constant 0 : index
    %0 = vector.load %arg0[%c0, %c0_0, %c0_1] : memref<8x8x16xf32, #tpu.memory_space<vmem>>, vector<8x8x16xf32>
    %1 = vector.shape_cast %0 : vector<8x8x16xf32> to vector<64x16xf32>
    %c0_2 = arith.constant 0 : index
    %c0_3 = arith.constant 0 : index
    %2 = vector.load %arg5[%c0_2, %c0_3] : memref<16x128xf32, #tpu.memory_space<vmem>>, vector<16x128xf32>
    %cst = arith.constant dense<0.000000e+00> : vector<64x128xf32>
    %3 = tpu.matmul %1, %2, %cst {dimension_numbers = #tpu.dot_dimension_numbers<[1], [0], [0], [1], [0, 0, 1, 1], [], []>} : vector<64x16xf32>, vector<16x128xf32>, vector<64x128xf32> -> vector<64x128xf32>
    %c0_4 = arith.constant 0 : index
    %c0_5 = arith.constant 0 : index
    %4 = vector.load %arg7[%c0_4, %c0_5] : memref<1x128xf32, #tpu.memory_space<vmem>>, vector<1x128xf32>
    %5 = vector.broadcast %4 : vector<1x128xf32> to vector<64x128xf32>
    %6 = arith.addf %3, %5 : vector<64x128xf32>
    %7 = vector.shape_cast %6 : vector<64x128xf32> to vector<8x8x128xf32>
    %c0_6 = arith.constant 0 : index
    %c0_7 = arith.constant 0 : index
    %c0_8 = arith.constant 0 : index
    %8 = vector.load %arg14[%c0_6, %c0_7, %c0_8] : memref<8x8x128xf32, #tpu.memory_space<vmem>>, vector<8x8x128xf32>
    tpu.vector_store %arg14[%c0_6, %c0_7, %c0_8], %7 {strides = array<i32>} : memref<8x8x128xf32, #tpu.memory_space<vmem>>, vector<8x8x128xf32>,
    %9 = tpu.iota {dimensions = array<i32: 1>} : vector<1x128xi32>
    %c64_i32 = arith.constant 64 : i32
    %10 = vector.broadcast %c64_i32 : i32 to vector<1x128xi32>
    %11 = arith.cmpi sge, %9, %10 : vector<1x128xi32>
    %c96_i32 = arith.constant 96 : i32
    %12 = vector.broadcast %c96_i32 : i32 to vector<1x128xi32>
    %13 = arith.cmpi slt, %9, %12 : vector<1x128xi32>
    %14 = arith.andi %11, %13 : vector<1x128xi1>
    %cst_9 = arith.constant 1.000000e+00 : f32
    %cst_10 = arith.constant 5.000000e-01 : f32
    %15 = vector.broadcast %cst_9 : f32 to vector<1x128xf32>
    %16 = vector.broadcast %cst_10 : f32 to vector<1x128xf32>
    %17 = arith.select %14, %15, %16 : vector<1x128xi1>, vector<1x128xf32>
    %cst_11 = arith.constant 0.000000e+00 : f32
    %cst_12 = arith.constant 5.000000e-01 : f32
    %18 = vector.broadcast %cst_11 : f32 to vector<1x128xf32>
    %19 = vector.broadcast %cst_12 : f32 to vector<1x128xf32>
    %20 = arith.select %14, %18, %19 : vector<1x128xi1>, vector<1x128xf32>
    %c0_13 = arith.constant 0 : index
    %c0_14 = arith.constant 0 : index
    %21 = vector.load %arg6[%c0_13, %c0_14] : memref<32x128xf32, #tpu.memory_space<vmem>>, vector<32x128xf32>
    %c0_15 = arith.constant 0 : index
    %c0_16 = arith.constant 0 : index
    %22 = vector.load %arg9[%c0_15, %c0_16] : memref<32x128xf32, #tpu.memory_space<vmem>>, vector<32x128xf32>
    %c0_17 = arith.constant 0 : index
    %c0_18 = arith.constant 0 : index
    %23 = vector.load %arg8[%c0_17, %c0_18] : memref<32x128xf32, #tpu.memory_space<vmem>>, vector<32x128xf32>
    %c0_19 = arith.constant 0 : index
    %c0_20 = arith.constant 0 : index
    %24 = vector.load %arg10[%c0_19, %c0_20] : memref<1x128xf32, #tpu.memory_space<vmem>>, vector<1x128xf32>
    %c0_21 = arith.constant 0 : index
    %c0_22 = arith.constant 0 : index
    %c0_23 = arith.constant 0 : index
    %25 = vector.load %arg1[%c0_21, %c0_22, %c0_23] : memref<2x8x32xf32, #tpu.memory_space<vmem>>, vector<1x8x32xf32>
    %26 = vector.shape_cast %25 : vector<1x8x32xf32> to vector<8x32xf32>
    %c0_24 = arith.constant 0 : index
    %c0_25 = arith.constant 0 : index
    %c0_26 = arith.constant 0 : index
    %27 = vector.load %arg2[%c0_24, %c0_25, %c0_26] : memref<2x8x32xf32, #tpu.memory_space<vmem>>, vector<1x8x32xf32>
    %28 = vector.shape_cast %27 : vector<1x8x32xf32> to vector<8x32xf32>
    %c1 = arith.constant 1 : index
    %c0_27 = arith.constant 0 : index
    %c0_28 = arith.constant 0 : index
    %29 = vector.load %arg1[%c1, %c0_27, %c0_28] : memref<2x8x32xf32, #tpu.memory_space<vmem>>, vector<1x8x32xf32>
    %30 = vector.shape_cast %29 : vector<1x8x32xf32> to vector<8x32xf32>
    %c1_29 = arith.constant 1 : index
    %c0_30 = arith.constant 0 : index
    %c0_31 = arith.constant 0 : index
    %31 = vector.load %arg2[%c1_29, %c0_30, %c0_31] : memref<2x8x32xf32, #tpu.memory_space<vmem>>, vector<1x8x32xf32>
    %32 = vector.shape_cast %31 : vector<1x8x32xf32> to vector<8x32xf32>
    %c0_32 = arith.constant 0 : index
    %c0_33 = arith.constant 0 : index
    %c0_34 = arith.constant 0 : index
    %33 = vector.load %arg14[%c0_32, %c0_33, %c0_34] : memref<8x8x128xf32, #tpu.memory_space<vmem>>, vector<1x8x128xf32>
    %34 = vector.shape_cast %33 : vector<1x8x128xf32> to vector<8x128xf32>
    %cst_35 = arith.constant dense<0.000000e+00> : vector<8x128xf32>
    %35 = tpu.matmul %26, %21, %cst_35 {dimension_numbers = #tpu.dot_dimension_numbers<[1], [0], [0], [1], [0, 0, 1, 1], [], []>} : vector<8x32xf32>, vector<32x128xf32>, vector<8x128xf32> -> vector<8x128xf32>
    %36 = arith.addf %34, %35 : vector<8x128xf32>
    %37 = vector.broadcast %17 : vector<1x128xf32> to vector<8x128xf32>
    %38 = arith.mulf %36, %37 : vector<8x128xf32>
    %39 = math.tanh %38 : vector<8x128xf32>
    %40 = vector.broadcast %17 : vector<1x128xf32> to vector<8x128xf32>
    %41 = arith.mulf %39, %40 : vector<8x128xf32>
    %42 = vector.broadcast %20 : vector<1x128xf32> to vector<8x128xf32>
    %43 = arith.addf %41, %42 : vector<8x128xf32>
    %44 = vector.extract_strided_slice %43 {offsets = [0, 0], sizes = [8, 32], strides = [1, 1]} : vector<8x128xf32> to vector<8x32xf32>
    %45 = vector.extract_strided_slice %43 {offsets = [0, 32], sizes = [8, 32], strides = [1, 1]} : vector<8x128xf32> to vector<8x32xf32>
    %46 = vector.extract_strided_slice %43 {offsets = [0, 64], sizes = [8, 32], strides = [1, 1]} : vector<8x128xf32> to vector<8x32xf32>
    %47 = vector.extract_strided_slice %43 {offsets = [0, 96], sizes = [8, 32], strides = [1, 1]} : vector<8x128xf32> to vector<8x32xf32>
    %48 = arith.mulf %45, %28 : vector<8x32xf32>
    %49 = arith.mulf %44, %46 : vector<8x32xf32>
    %50 = arith.addf %48, %49 : vector<8x32xf32>
    %51 = math.tanh %50 : vector<8x32xf32>
    %52 = arith.mulf %47, %51 : vector<8x32xf32>
    %c1_36 = arith.constant 1 : index
    %c0_37 = arith.constant 0 : index
    %c0_38 = arith.constant 0 : index
    %53 = vector.load %arg14[%c1_36, %c0_37, %c0_38] : memref<8x8x128xf32, #tpu.memory_space<vmem>>, vector<1x8x128xf32>
    %54 = vector.shape_cast %53 : vector<1x8x128xf32> to vector<8x128xf32>
    %cst_39 = arith.constant dense<0.000000e+00> : vector<8x128xf32>
    %55 = tpu.matmul %52, %21, %cst_39 {dimension_numbers = #tpu.dot_dimension_numbers<[1], [0], [0], [1], [0, 0, 1, 1], [], []>} : vector<8x32xf32>, vector<32x128xf32>, vector<8x128xf32> -> vector<8x128xf32>
    %56 = arith.addf %54, %55 : vector<8x128xf32>
    %57 = vector.broadcast %17 : vector<1x128xf32> to vector<8x128xf32>
    %58 = arith.mulf %56, %57 : vector<8x128xf32>
    %59 = math.tanh %58 : vector<8x128xf32>
    %60 = vector.broadcast %17 : vector<1x128xf32> to vector<8x128xf32>
    %61 = arith.mulf %59, %60 : vector<8x128xf32>
    %62 = vector.broadcast %20 : vector<1x128xf32> to vector<8x128xf32>
    %63 = arith.addf %61, %62 : vector<8x128xf32>
    %64 = vector.extract_strided_slice %63 {offsets = [0, 0], sizes = [8, 32], strides = [1, 1]} : vector<8x128xf32> to vector<8x32xf32>
    %65 = vector.extract_strided_slice %63 {offsets = [0, 32], sizes = [8, 32], strides = [1, 1]} : vector<8x128xf32> to vector<8x32xf32>
    %66 = vector.extract_strided_slice %63 {offsets = [0, 64], sizes = [8, 32], strides = [1, 1]} : vector<8x128xf32> to vector<8x32xf32>
    %67 = vector.extract_strided_slice %63 {offsets = [0, 96], sizes = [8, 32], strides = [1, 1]} : vector<8x128xf32> to vector<8x32xf32>
    %68 = arith.mulf %65, %50 : vector<8x32xf32>
    %69 = arith.mulf %64, %66 : vector<8x32xf32>
    %70 = arith.addf %68, %69 : vector<8x32xf32>
    %71 = math.tanh %70 : vector<8x32xf32>
    %72 = arith.mulf %67, %71 : vector<8x32xf32>
    %cst_40 = arith.constant dense<0.000000e+00> : vector<8x128xf32>
    %73 = tpu.matmul %52, %23, %cst_40 {dimension_numbers = #tpu.dot_dimension_numbers<[1], [0], [0], [1], [0, 0, 1, 1], [], []>} : vector<8x32xf32>, vector<32x128xf32>, vector<8x128xf32> -> vector<8x128xf32>
    %74 = vector.broadcast %24 : vector<1x128xf32> to vector<8x128xf32>
    %75 = arith.addf %73, %74 : vector<8x128xf32>
    %cst_41 = arith.constant dense<0.000000e+00> : vector<8x128xf32>
    %76 = tpu.matmul %30, %22, %cst_41 {dimension_numbers = #tpu.dot_dimension_numbers<[1], [0], [0], [1], [0, 0, 1, 1], [], []>} : vector<8x32xf32>, vector<32x128xf32>, vector<8x128xf32> -> vector<8x128xf32>
    %77 = arith.addf %75, %76 : vector<8x128xf32>
    %78 = vector.broadcast %17 : vector<1x128xf32> to vector<8x128xf32>
    %79 = arith.mulf %77, %78 : vector<8x128xf32>
    %80 = math.tanh %79 : vector<8x128xf32>
    %81 = vector.broadcast %17 : vector<1x128xf32> to vector<8x128xf32>
    %82 = arith.mulf %80, %81 : vector<8x128xf32>
    %83 = vector.broadcast %20 : vector<1x128xf32> to vector<8x128xf32>
    %84 = arith.addf %82, %83 : vector<8x128xf32>
    %85 = vector.extract_strided_slice %84 {offsets = [0, 0], sizes = [8, 32], strides = [1, 1]} : vector<8x128xf32> to vector<8x32xf32>
    %86 = vector.extract_strided_slice %84 {offsets = [0, 32], sizes = [8, 32], strides = [1, 1]} : vector<8x128xf32> to vector<8x32xf32>
    %87 = vector.extract_strided_slice %84 {offsets = [0, 64], sizes = [8, 32], strides = [1, 1]} : vector<8x128xf32> to vector<8x32xf32>
    %88 = vector.extract_strided_slice %84 {offsets = [0, 96], sizes = [8, 32], strides = [1, 1]} : vector<8x128xf32> to vector<8x32xf32>
    %89 = arith.mulf %86, %32 : vector<8x32xf32>
    %90 = arith.mulf %85, %87 : vector<8x32xf32>
    %91 = arith.addf %89, %90 : vector<8x32xf32>
    %92 = math.tanh %91 : vector<8x32xf32>
    %93 = arith.mulf %88, %92 : vector<8x32xf32>
    %c0_42 = arith.constant 0 : index
    %c0_43 = arith.constant 0 : index
    %c0_44 = arith.constant 0 : index
    %94 = vector.load %arg15[%c0_42, %c0_43, %c0_44] : memref<8x8x32xf32, #tpu.memory_space<vmem>>, vector<1x8x32xf32>
    %95 = vector.shape_cast %94 : vector<1x8x32xf32> to vector<8x32xf32>
    %96 = vector.shape_cast %93 : vector<8x32xf32> to vector<1x8x32xf32>
    tpu.vector_store %arg15[%c0_42, %c0_43, %c0_44], %96 {strides = array<i32>} : memref<8x8x32xf32, #tpu.memory_space<vmem>>, vector<1x8x32xf32>,
    %c2 = arith.constant 2 : index
    %c0_45 = arith.constant 0 : index
    %c0_46 = arith.constant 0 : index
    %97 = vector.load %arg14[%c2, %c0_45, %c0_46] : memref<8x8x128xf32, #tpu.memory_space<vmem>>, vector<1x8x128xf32>
    %98 = vector.shape_cast %97 : vector<1x8x128xf32> to vector<8x128xf32>
    %cst_47 = arith.constant dense<0.000000e+00> : vector<8x128xf32>
    %99 = tpu.matmul %72, %21, %cst_47 {dimension_numbers = #tpu.dot_dimension_numbers<[1], [0], [0], [1], [0, 0, 1, 1], [], []>} : vector<8x32xf32>, vector<32x128xf32>, vector<8x128xf32> -> vector<8x128xf32>
    %100 = arith.addf %98, %99 : vector<8x128xf32>
    %101 = vector.broadcast %17 : vector<1x128xf32> to vector<8x128xf32>
    %102 = arith.mulf %100, %101 : vector<8x128xf32>
    %103 = math.tanh %102 : vector<8x128xf32>
    %104 = vector.broadcast %17 : vector<1x128xf32> to vector<8x128xf32>
    %105 = arith.mulf %103, %104 : vector<8x128xf32>
    %106 = vector.broadcast %20 : vector<1x128xf32> to vector<8x128xf32>
    %107 = arith.addf %105, %106 : vector<8x128xf32>
    %108 = vector.extract_strided_slice %107 {offsets = [0, 0], sizes = [8, 32], strides = [1, 1]} : vector<8x128xf32> to vector<8x32xf32>
    %109 = vector.extract_strided_slice %107 {offsets = [0, 32], sizes = [8, 32], strides = [1, 1]} : vector<8x128xf32> to vector<8x32xf32>
    %110 = vector.extract_strided_slice %107 {offsets = [0, 64], sizes = [8, 32], strides = [1, 1]} : vector<8x128xf32> to vector<8x32xf32>
    %111 = vector.extract_strided_slice %107 {offsets = [0, 96], sizes = [8, 32], strides = [1, 1]} : vector<8x128xf32> to vector<8x32xf32>
    %112 = arith.mulf %109, %70 : vector<8x32xf32>
    %113 = arith.mulf %108, %110 : vector<8x32xf32>
    %114 = arith.addf %112, %113 : vector<8x32xf32>
    %115 = math.tanh %114 : vector<8x32xf32>
    %116 = arith.mulf %111, %115 : vector<8x32xf32>
    %cst_48 = arith.constant dense<0.000000e+00> : vector<8x128xf32>
    %117 = tpu.matmul %72, %23, %cst_48 {dimension_numbers = #tpu.dot_dimension_numbers<[1], [0], [0], [1], [0, 0, 1, 1], [], []>} : vector<8x32xf32>, vector<32x128xf32>, vector<8x128xf32> -> vector<8x128xf32>
    %118 = vector.broadcast %24 : vector<1x128xf32> to vector<8x128xf32>
    %119 = arith.addf %117, %118 : vector<8x128xf32>
    %cst_49 = arith.constant dense<0.000000e+00> : vector<8x128xf32>
    %120 = tpu.matmul %93, %22, %cst_49 {dimension_numbers = #tpu.dot_dimension_numbers<[1], [0], [0], [1], [0, 0, 1, 1], [], []>} : vector<8x32xf32>, vector<32x128xf32>, vector<8x128xf32> -> vector<8x128xf32>
    %121 = arith.addf %119, %120 : vector<8x128xf32>
    %122 = vector.broadcast %17 : vector<1x128xf32> to vector<8x128xf32>
    %123 = arith.mulf %121, %122 : vector<8x128xf32>
    %124 = math.tanh %123 : vector<8x128xf32>
    %125 = vector.broadcast %17 : vector<1x128xf32> to vector<8x128xf32>
    %126 = arith.mulf %124, %125 : vector<8x128xf32>
    %127 = vector.broadcast %20 : vector<1x128xf32> to vector<8x128xf32>
    %128 = arith.addf %126, %127 : vector<8x128xf32>
    %129 = vector.extract_strided_slice %128 {offsets = [0, 0], sizes = [8, 32], strides = [1, 1]} : vector<8x128xf32> to vector<8x32xf32>
    %130 = vector.extract_strided_slice %128 {offsets = [0, 32], sizes = [8, 32], strides = [1, 1]} : vector<8x128xf32> to vector<8x32xf32>
    %131 = vector.extract_strided_slice %128 {offsets = [0, 64], sizes = [8, 32], strides = [1, 1]} : vector<8x128xf32> to vector<8x32xf32>
    %132 = vector.extract_strided_slice %128 {offsets = [0, 96], sizes = [8, 32], strides = [1, 1]} : vector<8x128xf32> to vector<8x32xf32>
    %133 = arith.mulf %130, %91 : vector<8x32xf32>
    %134 = arith.mulf %129, %131 : vector<8x32xf32>
    %135 = arith.addf %133, %134 : vector<8x32xf32>
    %136 = math.tanh %135 : vector<8x32xf32>
    %137 = arith.mulf %132, %136 : vector<8x32xf32>
    %c1_50 = arith.constant 1 : index
    %c0_51 = arith.constant 0 : index
    %c0_52 = arith.constant 0 : index
    %138 = vector.load %arg15[%c1_50, %c0_51, %c0_52] : memref<8x8x32xf32, #tpu.memory_space<vmem>>, vector<1x8x32xf32>
    %139 = vector.shape_cast %138 : vector<1x8x32xf32> to vector<8x32xf32>
    %140 = vector.shape_cast %137 : vector<8x32xf32> to vector<1x8x32xf32>
    tpu.vector_store %arg15[%c1_50, %c0_51, %c0_52], %140 {strides = array<i32>} : memref<8x8x32xf32, #tpu.memory_space<vmem>>, vector<1x8x32xf32>,
    %c3 = arith.constant 3 : index
    %c0_53 = arith.constant 0 : index
    %c0_54 = arith.constant 0 : index
    %141 = vector.load %arg14[%c3, %c0_53, %c0_54] : memref<8x8x128xf32, #tpu.memory_space<vmem>>, vector<1x8x128xf32>
    %142 = vector.shape_cast %141 : vector<1x8x128xf32> to vector<8x128xf32>
    %cst_55 = arith.constant dense<0.000000e+00> : vector<8x128xf32>
    %143 = tpu.matmul %116, %21, %cst_55 {dimension_numbers = #tpu.dot_dimension_numbers<[1], [0], [0], [1], [0, 0, 1, 1], [], []>} : vector<8x32xf32>, vector<32x128xf32>, vector<8x128xf32> -> vector<8x128xf32>
    %144 = arith.addf %142, %143 : vector<8x128xf32>
    %145 = vector.broadcast %17 : vector<1x128xf32> to vector<8x128xf32>
    %146 = arith.mulf %144, %145 : vector<8x128xf32>
    %147 = math.tanh %146 : vector<8x128xf32>
    %148 = vector.broadcast %17 : vector<1x128xf32> to vector<8x128xf32>
    %149 = arith.mulf %147, %148 : vector<8x128xf32>
    %150 = vector.broadcast %20 : vector<1x128xf32> to vector<8x128xf32>
    %151 = arith.addf %149, %150 : vector<8x128xf32>
    %152 = vector.extract_strided_slice %151 {offsets = [0, 0], sizes = [8, 32], strides = [1, 1]} : vector<8x128xf32> to vector<8x32xf32>
    %153 = vector.extract_strided_slice %151 {offsets = [0, 32], sizes = [8, 32], strides = [1, 1]} : vector<8x128xf32> to vector<8x32xf32>
    %154 = vector.extract_strided_slice %151 {offsets = [0, 64], sizes = [8, 32], strides = [1, 1]} : vector<8x128xf32> to vector<8x32xf32>
    %155 = vector.extract_strided_slice %151 {offsets = [0, 96], sizes = [8, 32], strides = [1, 1]} : vector<8x128xf32> to vector<8x32xf32>
    %156 = arith.mulf %153, %114 : vector<8x32xf32>
    %157 = arith.mulf %152, %154 : vector<8x32xf32>
    %158 = arith.addf %156, %157 : vector<8x32xf32>
    %159 = math.tanh %158 : vector<8x32xf32>
    %160 = arith.mulf %155, %159 : vector<8x32xf32>
    %cst_56 = arith.constant dense<0.000000e+00> : vector<8x128xf32>
    %161 = tpu.matmul %116, %23, %cst_56 {dimension_numbers = #tpu.dot_dimension_numbers<[1], [0], [0], [1], [0, 0, 1, 1], [], []>} : vector<8x32xf32>, vector<32x128xf32>, vector<8x128xf32> -> vector<8x128xf32>
    %162 = vector.broadcast %24 : vector<1x128xf32> to vector<8x128xf32>
    %163 = arith.addf %161, %162 : vector<8x128xf32>
    %cst_57 = arith.constant dense<0.000000e+00> : vector<8x128xf32>
    %164 = tpu.matmul %137, %22, %cst_57 {dimension_numbers = #tpu.dot_dimension_numbers<[1], [0], [0], [1], [0, 0, 1, 1], [], []>} : vector<8x32xf32>, vector<32x128xf32>, vector<8x128xf32> -> vector<8x128xf32>
    %165 = arith.addf %163, %164 : vector<8x128xf32>
    %166 = vector.broadcast %17 : vector<1x128xf32> to vector<8x128xf32>
    %167 = arith.mulf %165, %166 : vector<8x128xf32>
    %168 = math.tanh %167 : vector<8x128xf32>
    %169 = vector.broadcast %17 : vector<1x128xf32> to vector<8x128xf32>
    %170 = arith.mulf %168, %169 : vector<8x128xf32>
    %171 = vector.broadcast %20 : vector<1x128xf32> to vector<8x128xf32>
    %172 = arith.addf %170, %171 : vector<8x128xf32>
    %173 = vector.extract_strided_slice %172 {offsets = [0, 0], sizes = [8, 32], strides = [1, 1]} : vector<8x128xf32> to vector<8x32xf32>
    %174 = vector.extract_strided_slice %172 {offsets = [0, 32], sizes = [8, 32], strides = [1, 1]} : vector<8x128xf32> to vector<8x32xf32>
    %175 = vector.extract_strided_slice %172 {offsets = [0, 64], sizes = [8, 32], strides = [1, 1]} : vector<8x128xf32> to vector<8x32xf32>
    %176 = vector.extract_strided_slice %172 {offsets = [0, 96], sizes = [8, 32], strides = [1, 1]} : vector<8x128xf32> to vector<8x32xf32>
    %177 = arith.mulf %174, %135 : vector<8x32xf32>
    %178 = arith.mulf %173, %175 : vector<8x32xf32>
    %179 = arith.addf %177, %178 : vector<8x32xf32>
    %180 = math.tanh %179 : vector<8x32xf32>
    %181 = arith.mulf %176, %180 : vector<8x32xf32>
    %c2_58 = arith.constant 2 : index
    %c0_59 = arith.constant 0 : index
    %c0_60 = arith.constant 0 : index
    %182 = vector.load %arg15[%c2_58, %c0_59, %c0_60] : memref<8x8x32xf32, #tpu.memory_space<vmem>>, vector<1x8x32xf32>
    %183 = vector.shape_cast %182 : vector<1x8x32xf32> to vector<8x32xf32>
    %184 = vector.shape_cast %181 : vector<8x32xf32> to vector<1x8x32xf32>
    tpu.vector_store %arg15[%c2_58, %c0_59, %c0_60], %184 {strides = array<i32>} : memref<8x8x32xf32, #tpu.memory_space<vmem>>, vector<1x8x32xf32>,
    %c4 = arith.constant 4 : index
    %c0_61 = arith.constant 0 : index
    %c0_62 = arith.constant 0 : index
    %185 = vector.load %arg14[%c4, %c0_61, %c0_62] : memref<8x8x128xf32, #tpu.memory_space<vmem>>, vector<1x8x128xf32>
    %186 = vector.shape_cast %185 : vector<1x8x128xf32> to vector<8x128xf32>
    %cst_63 = arith.constant dense<0.000000e+00> : vector<8x128xf32>
    %187 = tpu.matmul %160, %21, %cst_63 {dimension_numbers = #tpu.dot_dimension_numbers<[1], [0], [0], [1], [0, 0, 1, 1], [], []>} : vector<8x32xf32>, vector<32x128xf32>, vector<8x128xf32> -> vector<8x128xf32>
    %188 = arith.addf %186, %187 : vector<8x128xf32>
    %189 = vector.broadcast %17 : vector<1x128xf32> to vector<8x128xf32>
    %190 = arith.mulf %188, %189 : vector<8x128xf32>
    %191 = math.tanh %190 : vector<8x128xf32>
    %192 = vector.broadcast %17 : vector<1x128xf32> to vector<8x128xf32>
    %193 = arith.mulf %191, %192 : vector<8x128xf32>
    %194 = vector.broadcast %20 : vector<1x128xf32> to vector<8x128xf32>
    %195 = arith.addf %193, %194 : vector<8x128xf32>
    %196 = vector.extract_strided_slice %195 {offsets = [0, 0], sizes = [8, 32], strides = [1, 1]} : vector<8x128xf32> to vector<8x32xf32>
    %197 = vector.extract_strided_slice %195 {offsets = [0, 32], sizes = [8, 32], strides = [1, 1]} : vector<8x128xf32> to vector<8x32xf32>
    %198 = vector.extract_strided_slice %195 {offsets = [0, 64], sizes = [8, 32], strides = [1, 1]} : vector<8x128xf32> to vector<8x32xf32>
    %199 = vector.extract_strided_slice %195 {offsets = [0, 96], sizes = [8, 32], strides = [1, 1]} : vector<8x128xf32> to vector<8x32xf32>
    %200 = arith.mulf %197, %158 : vector<8x32xf32>
    %201 = arith.mulf %196, %198 : vector<8x32xf32>
    %202 = arith.addf %200, %201 : vector<8x32xf32>
    %203 = math.tanh %202 : vector<8x32xf32>
    %204 = arith.mulf %199, %203 : vector<8x32xf32>
    %cst_64 = arith.constant dense<0.000000e+00> : vector<8x128xf32>
    %205 = tpu.matmul %160, %23, %cst_64 {dimension_numbers = #tpu.dot_dimension_numbers<[1], [0], [0], [1], [0, 0, 1, 1], [], []>} : vector<8x32xf32>, vector<32x128xf32>, vector<8x128xf32> -> vector<8x128xf32>
    %206 = vector.broadcast %24 : vector<1x128xf32> to vector<8x128xf32>
    %207 = arith.addf %205, %206 : vector<8x128xf32>
    %cst_65 = arith.constant dense<0.000000e+00> : vector<8x128xf32>
    %208 = tpu.matmul %181, %22, %cst_65 {dimension_numbers = #tpu.dot_dimension_numbers<[1], [0], [0], [1], [0, 0, 1, 1], [], []>} : vector<8x32xf32>, vector<32x128xf32>, vector<8x128xf32> -> vector<8x128xf32>
    %209 = arith.addf %207, %208 : vector<8x128xf32>
    %210 = vector.broadcast %17 : vector<1x128xf32> to vector<8x128xf32>
    %211 = arith.mulf %209, %210 : vector<8x128xf32>
    %212 = math.tanh %211 : vector<8x128xf32>
    %213 = vector.broadcast %17 : vector<1x128xf32> to vector<8x128xf32>
    %214 = arith.mulf %212, %213 : vector<8x128xf32>
    %215 = vector.broadcast %20 : vector<1x128xf32> to vector<8x128xf32>
    %216 = arith.addf %214, %215 : vector<8x128xf32>
    %217 = vector.extract_strided_slice %216 {offsets = [0, 0], sizes = [8, 32], strides = [1, 1]} : vector<8x128xf32> to vector<8x32xf32>
    %218 = vector.extract_strided_slice %216 {offsets = [0, 32], sizes = [8, 32], strides = [1, 1]} : vector<8x128xf32> to vector<8x32xf32>
    %219 = vector.extract_strided_slice %216 {offsets = [0, 64], sizes = [8, 32], strides = [1, 1]} : vector<8x128xf32> to vector<8x32xf32>
    %220 = vector.extract_strided_slice %216 {offsets = [0, 96], sizes = [8, 32], strides = [1, 1]} : vector<8x128xf32> to vector<8x32xf32>
    %221 = arith.mulf %218, %179 : vector<8x32xf32>
    %222 = arith.mulf %217, %219 : vector<8x32xf32>
    %223 = arith.addf %221, %222 : vector<8x32xf32>
    %224 = math.tanh %223 : vector<8x32xf32>
    %225 = arith.mulf %220, %224 : vector<8x32xf32>
    %c3_66 = arith.constant 3 : index
    %c0_67 = arith.constant 0 : index
    %c0_68 = arith.constant 0 : index
    %226 = vector.load %arg15[%c3_66, %c0_67, %c0_68] : memref<8x8x32xf32, #tpu.memory_space<vmem>>, vector<1x8x32xf32>
    %227 = vector.shape_cast %226 : vector<1x8x32xf32> to vector<8x32xf32>
    %228 = vector.shape_cast %225 : vector<8x32xf32> to vector<1x8x32xf32>
    tpu.vector_store %arg15[%c3_66, %c0_67, %c0_68], %228 {strides = array<i32>} : memref<8x8x32xf32, #tpu.memory_space<vmem>>, vector<1x8x32xf32>,
    %c5 = arith.constant 5 : index
    %c0_69 = arith.constant 0 : index
    %c0_70 = arith.constant 0 : index
    %229 = vector.load %arg14[%c5, %c0_69, %c0_70] : memref<8x8x128xf32, #tpu.memory_space<vmem>>, vector<1x8x128xf32>
    %230 = vector.shape_cast %229 : vector<1x8x128xf32> to vector<8x128xf32>
    %cst_71 = arith.constant dense<0.000000e+00> : vector<8x128xf32>
    %231 = tpu.matmul %204, %21, %cst_71 {dimension_numbers = #tpu.dot_dimension_numbers<[1], [0], [0], [1], [0, 0, 1, 1], [], []>} : vector<8x32xf32>, vector<32x128xf32>, vector<8x128xf32> -> vector<8x128xf32>
    %232 = arith.addf %230, %231 : vector<8x128xf32>
    %233 = vector.broadcast %17 : vector<1x128xf32> to vector<8x128xf32>
    %234 = arith.mulf %232, %233 : vector<8x128xf32>
    %235 = math.tanh %234 : vector<8x128xf32>
    %236 = vector.broadcast %17 : vector<1x128xf32> to vector<8x128xf32>
    %237 = arith.mulf %235, %236 : vector<8x128xf32>
    %238 = vector.broadcast %20 : vector<1x128xf32> to vector<8x128xf32>
    %239 = arith.addf %237, %238 : vector<8x128xf32>
    %240 = vector.extract_strided_slice %239 {offsets = [0, 0], sizes = [8, 32], strides = [1, 1]} : vector<8x128xf32> to vector<8x32xf32>
    %241 = vector.extract_strided_slice %239 {offsets = [0, 32], sizes = [8, 32], strides = [1, 1]} : vector<8x128xf32> to vector<8x32xf32>
    %242 = vector.extract_strided_slice %239 {offsets = [0, 64], sizes = [8, 32], strides = [1, 1]} : vector<8x128xf32> to vector<8x32xf32>
    %243 = vector.extract_strided_slice %239 {offsets = [0, 96], sizes = [8, 32], strides = [1, 1]} : vector<8x128xf32> to vector<8x32xf32>
    %244 = arith.mulf %241, %202 : vector<8x32xf32>
    %245 = arith.mulf %240, %242 : vector<8x32xf32>
    %246 = arith.addf %244, %245 : vector<8x32xf32>
    %247 = math.tanh %246 : vector<8x32xf32>
    %248 = arith.mulf %243, %247 : vector<8x32xf32>
    %cst_72 = arith.constant dense<0.000000e+00> : vector<8x128xf32>
    %249 = tpu.matmul %204, %23, %cst_72 {dimension_numbers = #tpu.dot_dimension_numbers<[1], [0], [0], [1], [0, 0, 1, 1], [], []>} : vector<8x32xf32>, vector<32x128xf32>, vector<8x128xf32> -> vector<8x128xf32>
    %250 = vector.broadcast %24 : vector<1x128xf32> to vector<8x128xf32>
    %251 = arith.addf %249, %250 : vector<8x128xf32>
    %cst_73 = arith.constant dense<0.000000e+00> : vector<8x128xf32>
    %252 = tpu.matmul %225, %22, %cst_73 {dimension_numbers = #tpu.dot_dimension_numbers<[1], [0], [0], [1], [0, 0, 1, 1], [], []>} : vector<8x32xf32>, vector<32x128xf32>, vector<8x128xf32> -> vector<8x128xf32>
    %253 = arith.addf %251, %252 : vector<8x128xf32>
    %254 = vector.broadcast %17 : vector<1x128xf32> to vector<8x128xf32>
    %255 = arith.mulf %253, %254 : vector<8x128xf32>
    %256 = math.tanh %255 : vector<8x128xf32>
    %257 = vector.broadcast %17 : vector<1x128xf32> to vector<8x128xf32>
    %258 = arith.mulf %256, %257 : vector<8x128xf32>
    %259 = vector.broadcast %20 : vector<1x128xf32> to vector<8x128xf32>
    %260 = arith.addf %258, %259 : vector<8x128xf32>
    %261 = vector.extract_strided_slice %260 {offsets = [0, 0], sizes = [8, 32], strides = [1, 1]} : vector<8x128xf32> to vector<8x32xf32>
    %262 = vector.extract_strided_slice %260 {offsets = [0, 32], sizes = [8, 32], strides = [1, 1]} : vector<8x128xf32> to vector<8x32xf32>
    %263 = vector.extract_strided_slice %260 {offsets = [0, 64], sizes = [8, 32], strides = [1, 1]} : vector<8x128xf32> to vector<8x32xf32>
    %264 = vector.extract_strided_slice %260 {offsets = [0, 96], sizes = [8, 32], strides = [1, 1]} : vector<8x128xf32> to vector<8x32xf32>
    %265 = arith.mulf %262, %223 : vector<8x32xf32>
    %266 = arith.mulf %261, %263 : vector<8x32xf32>
    %267 = arith.addf %265, %266 : vector<8x32xf32>
    %268 = math.tanh %267 : vector<8x32xf32>
    %269 = arith.mulf %264, %268 : vector<8x32xf32>
    %c4_74 = arith.constant 4 : index
    %c0_75 = arith.constant 0 : index
    %c0_76 = arith.constant 0 : index
    %270 = vector.load %arg15[%c4_74, %c0_75, %c0_76] : memref<8x8x32xf32, #tpu.memory_space<vmem>>, vector<1x8x32xf32>
    %271 = vector.shape_cast %270 : vector<1x8x32xf32> to vector<8x32xf32>
    %272 = vector.shape_cast %269 : vector<8x32xf32> to vector<1x8x32xf32>
    tpu.vector_store %arg15[%c4_74, %c0_75, %c0_76], %272 {strides = array<i32>} : memref<8x8x32xf32, #tpu.memory_space<vmem>>, vector<1x8x32xf32>,
    %c6 = arith.constant 6 : index
    %c0_77 = arith.constant 0 : index
    %c0_78 = arith.constant 0 : index
    %273 = vector.load %arg14[%c6, %c0_77, %c0_78] : memref<8x8x128xf32, #tpu.memory_space<vmem>>, vector<1x8x128xf32>
    %274 = vector.shape_cast %273 : vector<1x8x128xf32> to vector<8x128xf32>
    %cst_79 = arith.constant dense<0.000000e+00> : vector<8x128xf32>
    %275 = tpu.matmul %248, %21, %cst_79 {dimension_numbers = #tpu.dot_dimension_numbers<[1], [0], [0], [1], [0, 0, 1, 1], [], []>} : vector<8x32xf32>, vector<32x128xf32>, vector<8x128xf32> -> vector<8x128xf32>
    %276 = arith.addf %274, %275 : vector<8x128xf32>
    %277 = vector.broadcast %17 : vector<1x128xf32> to vector<8x128xf32>
    %278 = arith.mulf %276, %277 : vector<8x128xf32>
    %279 = math.tanh %278 : vector<8x128xf32>
    %280 = vector.broadcast %17 : vector<1x128xf32> to vector<8x128xf32>
    %281 = arith.mulf %279, %280 : vector<8x128xf32>
    %282 = vector.broadcast %20 : vector<1x128xf32> to vector<8x128xf32>
    %283 = arith.addf %281, %282 : vector<8x128xf32>
    %284 = vector.extract_strided_slice %283 {offsets = [0, 0], sizes = [8, 32], strides = [1, 1]} : vector<8x128xf32> to vector<8x32xf32>
    %285 = vector.extract_strided_slice %283 {offsets = [0, 32], sizes = [8, 32], strides = [1, 1]} : vector<8x128xf32> to vector<8x32xf32>
    %286 = vector.extract_strided_slice %283 {offsets = [0, 64], sizes = [8, 32], strides = [1, 1]} : vector<8x128xf32> to vector<8x32xf32>
    %287 = vector.extract_strided_slice %283 {offsets = [0, 96], sizes = [8, 32], strides = [1, 1]} : vector<8x128xf32> to vector<8x32xf32>
    %288 = arith.mulf %285, %246 : vector<8x32xf32>
    %289 = arith.mulf %284, %286 : vector<8x32xf32>
    %290 = arith.addf %288, %289 : vector<8x32xf32>
    %291 = math.tanh %290 : vector<8x32xf32>
    %292 = arith.mulf %287, %291 : vector<8x32xf32>
    %cst_80 = arith.constant dense<0.000000e+00> : vector<8x128xf32>
    %293 = tpu.matmul %248, %23, %cst_80 {dimension_numbers = #tpu.dot_dimension_numbers<[1], [0], [0], [1], [0, 0, 1, 1], [], []>} : vector<8x32xf32>, vector<32x128xf32>, vector<8x128xf32> -> vector<8x128xf32>
    %294 = vector.broadcast %24 : vector<1x128xf32> to vector<8x128xf32>
    %295 = arith.addf %293, %294 : vector<8x128xf32>
    %cst_81 = arith.constant dense<0.000000e+00> : vector<8x128xf32>
    %296 = tpu.matmul %269, %22, %cst_81 {dimension_numbers = #tpu.dot_dimension_numbers<[1], [0], [0], [1], [0, 0, 1, 1], [], []>} : vector<8x32xf32>, vector<32x128xf32>, vector<8x128xf32> -> vector<8x128xf32>
    %297 = arith.addf %295, %296 : vector<8x128xf32>
    %298 = vector.broadcast %17 : vector<1x128xf32> to vector<8x128xf32>
    %299 = arith.mulf %297, %298 : vector<8x128xf32>
    %300 = math.tanh %299 : vector<8x128xf32>
    %301 = vector.broadcast %17 : vector<1x128xf32> to vector<8x128xf32>
    %302 = arith.mulf %300, %301 : vector<8x128xf32>
    %303 = vector.broadcast %20 : vector<1x128xf32> to vector<8x128xf32>
    %304 = arith.addf %302, %303 : vector<8x128xf32>
    %305 = vector.extract_strided_slice %304 {offsets = [0, 0], sizes = [8, 32], strides = [1, 1]} : vector<8x128xf32> to vector<8x32xf32>
    %306 = vector.extract_strided_slice %304 {offsets = [0, 32], sizes = [8, 32], strides = [1, 1]} : vector<8x128xf32> to vector<8x32xf32>
    %307 = vector.extract_strided_slice %304 {offsets = [0, 64], sizes = [8, 32], strides = [1, 1]} : vector<8x128xf32> to vector<8x32xf32>
    %308 = vector.extract_strided_slice %304 {offsets = [0, 96], sizes = [8, 32], strides = [1, 1]} : vector<8x128xf32> to vector<8x32xf32>
    %309 = arith.mulf %306, %267 : vector<8x32xf32>
    %310 = arith.mulf %305, %307 : vector<8x32xf32>
    %311 = arith.addf %309, %310 : vector<8x32xf32>
    %312 = math.tanh %311 : vector<8x32xf32>
    %313 = arith.mulf %308, %312 : vector<8x32xf32>
    %c5_82 = arith.constant 5 : index
    %c0_83 = arith.constant 0 : index
    %c0_84 = arith.constant 0 : index
    %314 = vector.load %arg15[%c5_82, %c0_83, %c0_84] : memref<8x8x32xf32, #tpu.memory_space<vmem>>, vector<1x8x32xf32>
    %315 = vector.shape_cast %314 : vector<1x8x32xf32> to vector<8x32xf32>
    %316 = vector.shape_cast %313 : vector<8x32xf32> to vector<1x8x32xf32>
    tpu.vector_store %arg15[%c5_82, %c0_83, %c0_84], %316 {strides = array<i32>} : memref<8x8x32xf32, #tpu.memory_space<vmem>>, vector<1x8x32xf32>,
    %c7 = arith.constant 7 : index
    %c0_85 = arith.constant 0 : index
    %c0_86 = arith.constant 0 : index
    %317 = vector.load %arg14[%c7, %c0_85, %c0_86] : memref<8x8x128xf32, #tpu.memory_space<vmem>>, vector<1x8x128xf32>
    %318 = vector.shape_cast %317 : vector<1x8x128xf32> to vector<8x128xf32>
    %cst_87 = arith.constant dense<0.000000e+00> : vector<8x128xf32>
    %319 = tpu.matmul %292, %21, %cst_87 {dimension_numbers = #tpu.dot_dimension_numbers<[1], [0], [0], [1], [0, 0, 1, 1], [], []>} : vector<8x32xf32>, vector<32x128xf32>, vector<8x128xf32> -> vector<8x128xf32>
    %320 = arith.addf %318, %319 : vector<8x128xf32>
    %321 = vector.broadcast %17 : vector<1x128xf32> to vector<8x128xf32>
    %322 = arith.mulf %320, %321 : vector<8x128xf32>
    %323 = math.tanh %322 : vector<8x128xf32>
    %324 = vector.broadcast %17 : vector<1x128xf32> to vector<8x128xf32>
    %325 = arith.mulf %323, %324 : vector<8x128xf32>
    %326 = vector.broadcast %20 : vector<1x128xf32> to vector<8x128xf32>
    %327 = arith.addf %325, %326 : vector<8x128xf32>
    %328 = vector.extract_strided_slice %327 {offsets = [0, 0], sizes = [8, 32], strides = [1, 1]} : vector<8x128xf32> to vector<8x32xf32>
    %329 = vector.extract_strided_slice %327 {offsets = [0, 32], sizes = [8, 32], strides = [1, 1]} : vector<8x128xf32> to vector<8x32xf32>
    %330 = vector.extract_strided_slice %327 {offsets = [0, 64], sizes = [8, 32], strides = [1, 1]} : vector<8x128xf32> to vector<8x32xf32>
    %331 = vector.extract_strided_slice %327 {offsets = [0, 96], sizes = [8, 32], strides = [1, 1]} : vector<8x128xf32> to vector<8x32xf32>
    %332 = arith.mulf %329, %290 : vector<8x32xf32>
    %333 = arith.mulf %328, %330 : vector<8x32xf32>
    %334 = arith.addf %332, %333 : vector<8x32xf32>
    %335 = math.tanh %334 : vector<8x32xf32>
    %336 = arith.mulf %331, %335 : vector<8x32xf32>
    %cst_88 = arith.constant dense<0.000000e+00> : vector<8x128xf32>
    %337 = tpu.matmul %292, %23, %cst_88 {dimension_numbers = #tpu.dot_dimension_numbers<[1], [0], [0], [1], [0, 0, 1, 1], [], []>} : vector<8x32xf32>, vector<32x128xf32>, vector<8x128xf32> -> vector<8x128xf32>
    %338 = vector.broadcast %24 : vector<1x128xf32> to vector<8x128xf32>
    %339 = arith.addf %337, %338 : vector<8x128xf32>
    %cst_89 = arith.constant dense<0.000000e+00> : vector<8x128xf32>
    %340 = tpu.matmul %313, %22, %cst_89 {dimension_numbers = #tpu.dot_dimension_numbers<[1], [0], [0], [1], [0, 0, 1, 1], [], []>} : vector<8x32xf32>, vector<32x128xf32>, vector<8x128xf32> -> vector<8x128xf32>
    %341 = arith.addf %339, %340 : vector<8x128xf32>
    %342 = vector.broadcast %17 : vector<1x128xf32> to vector<8x128xf32>
    %343 = arith.mulf %341, %342 : vector<8x128xf32>
    %344 = math.tanh %343 : vector<8x128xf32>
    %345 = vector.broadcast %17 : vector<1x128xf32> to vector<8x128xf32>
    %346 = arith.mulf %344, %345 : vector<8x128xf32>
    %347 = vector.broadcast %20 : vector<1x128xf32> to vector<8x128xf32>
    %348 = arith.addf %346, %347 : vector<8x128xf32>
    %349 = vector.extract_strided_slice %348 {offsets = [0, 0], sizes = [8, 32], strides = [1, 1]} : vector<8x128xf32> to vector<8x32xf32>
    %350 = vector.extract_strided_slice %348 {offsets = [0, 32], sizes = [8, 32], strides = [1, 1]} : vector<8x128xf32> to vector<8x32xf32>
    %351 = vector.extract_strided_slice %348 {offsets = [0, 64], sizes = [8, 32], strides = [1, 1]} : vector<8x128xf32> to vector<8x32xf32>
    %352 = vector.extract_strided_slice %348 {offsets = [0, 96], sizes = [8, 32], strides = [1, 1]} : vector<8x128xf32> to vector<8x32xf32>
    %353 = arith.mulf %350, %311 : vector<8x32xf32>
    %354 = arith.mulf %349, %351 : vector<8x32xf32>
    %355 = arith.addf %353, %354 : vector<8x32xf32>
    %356 = math.tanh %355 : vector<8x32xf32>
    %357 = arith.mulf %352, %356 : vector<8x32xf32>
    %c6_90 = arith.constant 6 : index
    %c0_91 = arith.constant 0 : index
    %c0_92 = arith.constant 0 : index
    %358 = vector.load %arg15[%c6_90, %c0_91, %c0_92] : memref<8x8x32xf32, #tpu.memory_space<vmem>>, vector<1x8x32xf32>
    %359 = vector.shape_cast %358 : vector<1x8x32xf32> to vector<8x32xf32>
    %360 = vector.shape_cast %357 : vector<8x32xf32> to vector<1x8x32xf32>
    tpu.vector_store %arg15[%c6_90, %c0_91, %c0_92], %360 {strides = array<i32>} : memref<8x8x32xf32, #tpu.memory_space<vmem>>, vector<1x8x32xf32>,
    %cst_93 = arith.constant dense<0.000000e+00> : vector<8x128xf32>
    %361 = tpu.matmul %336, %23, %cst_93 {dimension_numbers = #tpu.dot_dimension_numbers<[1], [0], [0], [1], [0, 0, 1, 1], [], []>} : vector<8x32xf32>, vector<32x128xf32>, vector<8x128xf32> -> vector<8x128xf32>
    %362 = vector.broadcast %24 : vector<1x128xf32> to vector<8x128xf32>
    %363 = arith.addf %361, %362 : vector<8x128xf32>
    %cst_94 = arith.constant dense<0.000000e+00> : vector<8x128xf32>
    %364 = tpu.matmul %357, %22, %cst_94 {dimension_numbers = #tpu.dot_dimension_numbers<[1], [0], [0], [1], [0, 0, 1, 1], [], []>} : vector<8x32xf32>, vector<32x128xf32>, vector<8x128xf32> -> vector<8x128xf32>
    %365 = arith.addf %363, %364 : vector<8x128xf32>
    %366 = vector.broadcast %17 : vector<1x128xf32> to vector<8x128xf32>
    %367 = arith.mulf %365, %366 : vector<8x128xf32>
    %368 = math.tanh %367 : vector<8x128xf32>
    %369 = vector.broadcast %17 : vector<1x128xf32> to vector<8x128xf32>
    %370 = arith.mulf %368, %369 : vector<8x128xf32>
    %371 = vector.broadcast %20 : vector<1x128xf32> to vector<8x128xf32>
    %372 = arith.addf %370, %371 : vector<8x128xf32>
    %373 = vector.extract_strided_slice %372 {offsets = [0, 0], sizes = [8, 32], strides = [1, 1]} : vector<8x128xf32> to vector<8x32xf32>
    %374 = vector.extract_strided_slice %372 {offsets = [0, 32], sizes = [8, 32], strides = [1, 1]} : vector<8x128xf32> to vector<8x32xf32>
    %375 = vector.extract_strided_slice %372 {offsets = [0, 64], sizes = [8, 32], strides = [1, 1]} : vector<8x128xf32> to vector<8x32xf32>
    %376 = vector.extract_strided_slice %372 {offsets = [0, 96], sizes = [8, 32], strides = [1, 1]} : vector<8x128xf32> to vector<8x32xf32>
    %377 = arith.mulf %374, %355 : vector<8x32xf32>
    %378 = arith.mulf %373, %375 : vector<8x32xf32>
    %379 = arith.addf %377, %378 : vector<8x32xf32>
    %380 = math.tanh %379 : vector<8x32xf32>
    %381 = arith.mulf %376, %380 : vector<8x32xf32>
    %c7_95 = arith.constant 7 : index
    %c0_96 = arith.constant 0 : index
    %c0_97 = arith.constant 0 : index
    %382 = vector.load %arg15[%c7_95, %c0_96, %c0_97] : memref<8x8x32xf32, #tpu.memory_space<vmem>>, vector<1x8x32xf32>
    %383 = vector.shape_cast %382 : vector<1x8x32xf32> to vector<8x32xf32>
    %384 = vector.shape_cast %381 : vector<8x32xf32> to vector<1x8x32xf32>
    tpu.vector_store %arg15[%c7_95, %c0_96, %c0_97], %384 {strides = array<i32>} : memref<8x8x32xf32, #tpu.memory_space<vmem>>, vector<1x8x32xf32>,
    %c0_98 = arith.constant 0 : index
    %c0_99 = arith.constant 0 : index
    %c0_100 = arith.constant 0 : index
    %385 = vector.load %arg12[%c0_98, %c0_99, %c0_100] : memref<2x8x32xf32, #tpu.memory_space<vmem>>, vector<1x8x32xf32>
    %386 = vector.shape_cast %385 : vector<1x8x32xf32> to vector<8x32xf32>
    %387 = vector.shape_cast %336 : vector<8x32xf32> to vector<1x8x32xf32>
    tpu.vector_store %arg12[%c0_98, %c0_99, %c0_100], %387 {strides = array<i32>} : memref<2x8x32xf32, #tpu.memory_space<vmem>>, vector<1x8x32xf32>,
    %c0_101 = arith.constant 0 : index
    %c0_102 = arith.constant 0 : index
    %c0_103 = arith.constant 0 : index
    %388 = vector.load %arg13[%c0_101, %c0_102, %c0_103] : memref<2x8x32xf32, #tpu.memory_space<vmem>>, vector<1x8x32xf32>
    %389 = vector.shape_cast %388 : vector<1x8x32xf32> to vector<8x32xf32>
    %390 = vector.shape_cast %334 : vector<8x32xf32> to vector<1x8x32xf32>
    tpu.vector_store %arg13[%c0_101, %c0_102, %c0_103], %390 {strides = array<i32>} : memref<2x8x32xf32, #tpu.memory_space<vmem>>, vector<1x8x32xf32>,
    %c1_104 = arith.constant 1 : index
    %c0_105 = arith.constant 0 : index
    %c0_106 = arith.constant 0 : index
    %391 = vector.load %arg12[%c1_104, %c0_105, %c0_106] : memref<2x8x32xf32, #tpu.memory_space<vmem>>, vector<1x8x32xf32>
    %392 = vector.shape_cast %391 : vector<1x8x32xf32> to vector<8x32xf32>
    %393 = vector.shape_cast %381 : vector<8x32xf32> to vector<1x8x32xf32>
    tpu.vector_store %arg12[%c1_104, %c0_105, %c0_106], %393 {strides = array<i32>} : memref<2x8x32xf32, #tpu.memory_space<vmem>>, vector<1x8x32xf32>,
    %c1_107 = arith.constant 1 : index
    %c0_108 = arith.constant 0 : index
    %c0_109 = arith.constant 0 : index
    %394 = vector.load %arg13[%c1_107, %c0_108, %c0_109] : memref<2x8x32xf32, #tpu.memory_space<vmem>>, vector<1x8x32xf32>
    %395 = vector.shape_cast %394 : vector<1x8x32xf32> to vector<8x32xf32>
    %396 = vector.shape_cast %379 : vector<8x32xf32> to vector<1x8x32xf32>
    tpu.vector_store %arg13[%c1_107, %c0_108, %c0_109], %396 {strides = array<i32>} : memref<2x8x32xf32, #tpu.memory_space<vmem>>, vector<1x8x32xf32>,
    %c0_110 = arith.constant 0 : index
    %c0_111 = arith.constant 0 : index
    %c0_112 = arith.constant 0 : index
    %397 = vector.load %arg15[%c0_110, %c0_111, %c0_112] : memref<8x8x32xf32, #tpu.memory_space<vmem>>, vector<8x8x32xf32>
    %c0_113 = arith.constant 0 : index
    %c0_114 = arith.constant 0 : index
    %398 = vector.load %arg3[%c0_113, %c0_114] : memref<1x32xf32, #tpu.memory_space<vmem>>, vector<1x32xf32>
    %399 = vector.shape_cast %398 : vector<1x32xf32> to vector<1x1x32xf32>
    %400 = vector.broadcast %399 : vector<1x1x32xf32> to vector<8x8x32xf32>
    %401 = arith.mulf %397, %400 : vector<8x8x32xf32>
    %cst_115 = arith.constant dense<0.000000e+00> : vector<8x8xf32>
    %402 = vector.multi_reduction <add>, %401, %cst_115 [2] : vector<8x8x32xf32> to vector<8x8xf32>
    %c0_116 = arith.constant 0 : index
    %c0_117 = arith.constant 0 : index
    %403 = vector.load %arg4[%c0_116, %c0_117] : memref<1x1xf32, #tpu.memory_space<vmem>>, vector<1x1xf32>
    %404 = vector.broadcast %403 : vector<1x1xf32> to vector<8x8xf32>
    %405 = arith.addf %402, %404 : vector<8x8xf32>
    %c0_118 = arith.constant 0 : index
    %c0_119 = arith.constant 0 : index
    %406 = vector.load %arg11[%c0_118, %c0_119] : memref<8x8xf32, #tpu.memory_space<vmem>>, vector<8x8xf32>
    tpu.vector_store %arg11[%c0_118, %c0_119], %405 {strides = array<i32>} : memref<8x8xf32, #tpu.memory_space<vmem>>, vector<8x8xf32>,
    return
  }
}

</mosaic_0001>

<bundles_post_ra>
// kernel: vestim_lstm_forward.1
= control target key start
LH: loop header
LB: loop body
LE: loop exit
PB: predicated region body
PF: predicated region fallthrough
CT: control target
= control target key end

     0   :  { %vm57_vm0 = vcmask 130048   ;;  %vm158_vm1 = vcmask 261120   ;;  %v131_v8 = vlaneseq  ;;  %v1353_v13 = vmov 0.5   ;;  %s1355_s26 = smov 32   ;;  %s1356_s22 = smov 96   ;;  %s1871_s6 = inlined_call_operand.vmem [shape: f32[32,128], index: 6, kind: input, shape index: {}]   ;;  %s1872_s5 = inlined_call_operand.vmem [shape: f32[16,128], index: 5, kind: input, shape index: {}]   ;;  %s1873_s0 = inlined_call_operand.vmem [shape: f32[8,8,16], index: 0, kind: input, shape index: {}]   ;;  %s1874_s7 = inlined_call_operand.vmem [shape: f32[1,128], index: 7, kind: input, shape index: {}]   ;;  %s1875_s1 = inlined_call_operand.vmem [shape: f32[2,8,32], index: 1, kind: input, shape index: {}]   ;;  %s1876_s2 = inlined_call_operand.vmem [shape: f32[2,8,32], index: 2, kind: input, shape index: {}]   ;;  %s1877_s8 = inlined_call_operand.vmem [shape: f32[32,128], index: 8, kind: input, shape index: {}]   ;;  %s1878_s9 = inlined_call_operand.vmem [shape: f32[32,128], index: 9, kind: input, shape index: {}]   ;;  %s1879_s10 = inlined_call_operand.vmem [shape: f32[1,128], index: 10, kind: input, shape index: {}]   ;;  %s1880_s3 = inlined_call_operand.vmem [shape: f32[1,32], index: 3, kind: input, shape index: {}]   ;;  %s1881_s12 = inlined_call_operand.vmem [shape: f32[2,8,32], index: 12, kind: output, shape index: {1}]   ;;  %s1882_s13 = inlined_call_operand.vmem [shape: f32[2,8,32], index: 13, kind: output, shape index: {2}]   ;;  %s1883_s4 = inlined_call_operand.<no memory space> [shape: f32[1,1], index: 4, kind: input, shape index: {}]   ;;  %s1884_s11 = inlined_call_operand.vmem [shape: f32[8,8], index: 11, kind: output, shape index: {0}]  }
   0x1   :  { %v1431_v0 = vld [vmem:[%s1871_s6 + $0x18] sm:$0xff]  ;;  %v52_v1 = vld [vmem:[%s1872_s5 + $0x8] sm:$0xff]  ;;  %v1439_v2 = vld [vmem:[%s1871_s6 + $0x10] sm:$0xff]  ;;  %vm1213_vm5 = vcmask 1041409   ;;  %vm1215_vm6 = vcmask 1042434   ;;  %vm1217_vm7 = vcmask 1043459  }
   0x2   :  { %174 = vmatpush.msra.mxu1 %v1431_v0  ;;  %96 = vmatpush.msra.mxu0 %v52_v1  ;;  %v51_v3 = vld [vmem:[%s1872_s5] sm:$0xff]  ;;  %v1451_v5 = vld [vmem:[%s1871_s6 + $0x8] sm:$0xff]  ;;  %v1474_v9 = vand.u32 127, %v131_v8  ;;  %v1504_v30 = vld [vmem:[%s1877_s8 + $0x18] sm:$0xff]  ;;  %vm1219_vm8 = vcmask 1044484   ;;  %vm1221_vm9 = vcmask 1045509  }
   0x3   :  { %v43_v4 = vld [vmem:[%s1873_s0] sm:$0xff]  ;;  %227 = vmatpush.msra.mxu2 %v1431_v0  ;;  %v1509_v31 = vld [vmem:[%s1877_s8 + $0x10] sm:$0xff]  ;;  %272 = vmatpush.msra.mxu3 %v1504_v30  ;;  %v1515_v32 = vld [vmem:[%s1877_s8 + $0x8] sm:$0xff]  ;;  %vm1223_vm10 = vcmask 1046534   ;;  %vm1225_vm11 = vcmask 1047559   ;;  %vm1228_vm12 = vcmask 64512  }
   0x4   :  { %175 = vmatpush.msra.mxu1 %v1439_v2  ;;  %97 = vmatpush.msra.mxu0 %v51_v3  ;;  %v1459_v6 = vld [vmem:[%s1871_s6] sm:$0xff]  ;;  %vm133_vm2 = vcmp.ge.s32.totalorder %v1474_v9, 64  ;;  %vm134_vm3 = vcmp.lt.s32.totalorder %v1474_v9, 96  ;;  %v1533_v36 = vld [vmem:[%s1878_s9 + $0x18] sm:$0xff]  ;;  %v1538_v37 = vld [vmem:[%s1878_s9 + $0x10] sm:$0xff] }
   0x5   :  { %1242 = vmatmul.msk.f32.vlgmr.msra.gmra.mxu0 %vm57_vm0, %v43_v4  ;;  %228 = vmatpush.msra.mxu2 %v1439_v2  ;;  %v151_v7 = vld [vmem:[%s1875_s1] sm:$0xff]  ;;  %vm135_vm4 = vmand %vm133_vm2, %vm134_vm3  ;;  %v44_v38 = vld [vmem:[%s1873_s0 + $0x8] sm:$0xff] }
   0x6   :  { %176 = vmatpush.msra.mxu1 %v1451_v5  ;;  %v1479_v10 = vld [vmem:[%s1874_s7] ss:$0 sm:$0xff]  ;;  %v1484_v14 = vsel %vm135_vm4, 1.0, %v1353_v13  ;;  %v1487_v19 = vsel %vm135_vm4, 0.0, %v1353_v13  ;;  %s1354_s7 = smov 64   ;;  %273 = vmatpush.msra.mxu3 %v1509_v31  ;;  %v1548_v39 = vld [vmem:[%s1878_s9 + $0x8] sm:$0xff] }
   0x7   :  { %229 = vmatpush.msra.mxu2 %v1451_v5  ;;  %v152_v22 = vld [vmem:[%s1876_s2] sm:$0xff]  ;;  %v1250_v41 = vld [vmem:[%s1875_s1 + $0x8] sm:$0xff] }
   0x8   :  { %177 = vmatpush.msra.mxu1 %v1459_v6  ;;  %v1521_v33 = vld [vmem:[%s1877_s8] sm:$0xff]  ;;  %274 = vmatpush.msra.mxu3 %v1515_v32  ;;  %v1251_v60 = vld [vmem:[%s1876_s2 + $0x8] sm:$0xff] }
   0x9   :  { %1252 = vmatmul.msk.f32.vlgmr.msra.gmra.mxu1 %vm158_vm1, %v151_v7  ;;  %230 = vmatpush.msra.mxu2 %v1459_v6  ;;  %v1554_v40 = vld [vmem:[%s1878_s9] sm:$0xff] }
   0xa   :  { %275 = vmatpush.msra.mxu3 %v1521_v33  ;;  %295 = vmatpush.msrb.mxu1 %v1533_v36  ;;  %v1584_v45 = vld [vmem:[%s1879_s10] ss:$0 sm:$0xff] }
   0xb   :  { %353 = vmatpush.msrb.mxu2 %v1431_v0 }
   0xc   :  { %395 = vmatpush.msrb.mxu3 %v1504_v30  ;;  %296 = vmatpush.msrb.mxu1 %v1538_v37 }
   0xd   :  { %354 = vmatpush.msrb.mxu2 %v1439_v2  ;;  %1243 = vmatmul.msk.f32.gmra.mxu0 %vm57_vm0, %v44_v38 }
   0xe   :  { %396 = vmatpush.msrb.mxu3 %v1509_v31  ;;  %297 = vmatpush.msrb.mxu1 %v1548_v39 }
   0xf   :  { %355 = vmatpush.msrb.mxu2 %v1451_v5 }
  0x10   :  { %397 = vmatpush.msrb.mxu3 %v1515_v32  ;;  %298 = vmatpush.msrb.mxu1 %v1554_v40 }
  0x11   :  { %356 = vmatpush.msrb.mxu2 %v1459_v6  ;;  %1255 = vmatmul.msk.f32.vlgmr.msrb.gmra.mxu1 %vm158_vm1, %v1250_v41 }
  0x12   :  { %398 = vmatpush.msrb.mxu3 %v1521_v33  ;;  %417 = vmatpush.msra.mxu1 %v1533_v36 }
  0x14   :  { %418 = vmatpush.msra.mxu1 %v1538_v37 }
  0x16   :  { %419 = vmatpush.msra.mxu1 %v1548_v39 }
  0x18   :  { %420 = vmatpush.msra.mxu1 %v1554_v40 }
  0x1a   :  { %536 = vmatpush.msrb.mxu1 %v1533_v36 }
  0x1c   :  { %537 = vmatpush.msrb.mxu1 %v1538_v37 }
  0x1e   :  { %538 = vmatpush.msrb.mxu1 %v1548_v39 }
  0x20   :  { %539 = vmatpush.msrb.mxu1 %v1554_v40 }
  0x82   :  { %v99_v11 = vpop.f32.mrf.mxu0 }
  0x83   :  { %v100_v12 = vadd.f32 %v1479_v10, %v99_v11 }
  0x86   :  { %v179_v15 = vpop.f32.mrf.mxu1 }
  0x87   :  { %v182_v16 = vadd.f32 %v179_v15, %v100_v12 }
  0x89   :  { %v183_v17 = vmul.f32 %v182_v16, %v1484_v14 }
  0x8a   :  { %v102_v43 = vpop.f32.mrf.mxu0 }
  0x8b   :  { %1289 = vtanh.f32 %v183_v17  ;;  %v103_v44 = vadd.f32 %v1479_v10, %v102_v43 }
  0x8e   :  { %v300_v46 = vpop.f32.mrf.mxu1 }
  0x91   :  { %v1290_v18 = vpop.eup %1289 }
  0x92   :  { %v185_v20 = vmul.f32 %v1290_v18, %v1484_v14 }
  0x94   :  { %v186_v21 = vadd.f32 %v185_v20, %v1487_v19 }
  0x96   :  { %193 = vrot.lane.b32.xlu0 %v186_v21, %s1354_s7 }
  0x9e   :  { %188 = vrot.lane.b32.xlu0 %v152_v22, %s1355_s26  ;;  %v45_v22 = vld [vmem:[%s1873_s0 + $0x10] sm:$0xff] }
  0x9f   :  { %1244 = vmatmul.msk.f32.gmra.mxu0 %vm57_vm0, %v45_v22 }
 0x108   :  { %v194_v23 = vpop.permute.xlu0 %193 }
 0x109   :  { %v196_v24 = vmul.f32 %v194_v23, %v186_v21 }
 0x10b   :  { %198 = vrot.lane.b32.xlu1 %v196_v24, %s1355_s26 }
 0x110   :  { %v189_v25 = vpop.permute.xlu0 %188 }
 0x111   :  { %v191_v26 = vmul.f32 %v189_v25, %v186_v21 }
 0x11c   :  { %v105_v25 = vpop.f32.mrf.mxu0 }
 0x17d   :  { %v199_v27 = vpop.permute.xlu1 %198 }
 0x17e   :  { %v1497_v28 = vadd.f32 %v199_v27, %v191_v26  ;;  %v106_v26 = vadd.f32 %v1479_v10, %v105_v25 }
 0x180   :  { %1291 = vtanh.f32 %v1497_v28 }
 0x186   :  { %v1292_v29 = vpop.eup %1291 }
 0x187   :  { %204 = vrot.lane.b32.xlu1 %v1292_v29, %s1354_s7 }
 0x1f9   :  { %v205_v34 = vpop.permute.xlu1 %204 }
 0x1fa   :  { %v207_v35 = vmul.f32 %v205_v34, %v186_v21 }
 0x1fc   :  { %211 = vrot.lane.b32.xlu2 %v207_v35, %s1355_s26 }
 0x256   :  { %v212_v42 = vpop.permute.xlu2 %211 }
 0x257   :  { %1253 = vmatmul.msk.f32.vlgmr.msra.gmra.mxu2 %vm158_vm1, %v212_v42  ;;  %1254 = vmatmul.msk.f32.vlgmr.msra.gmra.mxu3 %vm158_vm1, %v212_v42 }
 0x258   :  { %472 = vmatpush.msra.mxu2 %v1431_v0  ;;  %514 = vmatpush.msra.mxu3 %v1504_v30 }
 0x25a   :  { %473 = vmatpush.msra.mxu2 %v1439_v2  ;;  %515 = vmatpush.msra.mxu3 %v1509_v31 }
 0x25c   :  { %474 = vmatpush.msra.mxu2 %v1451_v5  ;;  %516 = vmatpush.msra.mxu3 %v1515_v32 }
 0x25e   :  { %475 = vmatpush.msra.mxu2 %v1459_v6  ;;  %517 = vmatpush.msra.mxu3 %v1521_v33 }
 0x2da   :  { %v232_v47 = vpop.f32.mrf.mxu2  ;;  %v277_v48 = vpop.f32.mrf.mxu3 }
 0x2db   :  { %v235_v49 = vadd.f32 %v232_v47, %v103_v44  ;;  %v278_v50 = vadd.f32 %v1584_v45, %v277_v48 }
 0x2dd   :  { %v236_v51 = vmul.f32 %v235_v49, %v1484_v14  ;;  %v303_v52 = vadd.f32 %v300_v46, %v278_v50 }
 0x2df   :  { %1293 = vtanh.f32 %v236_v51  ;;  %v304_v53 = vmul.f32 %v303_v52, %v1484_v14 }
 0x2e1   :  { %1295 = vtanh.f32 %v304_v53 }
 0x2e5   :  { %v1294_v54 = vpop.eup %1293 }
 0x2e6   :  { %v238_v55 = vmul.f32 %v1294_v54, %v1484_v14 }
 0x2e7   :  { %v1296_v56 = vpop.eup %1295 }
 0x2e8   :  { %v239_v57 = vadd.f32 %v238_v55, %v1487_v19  ;;  %v306_v58 = vmul.f32 %v1296_v56, %v1484_v14 }
 0x2ea   :  { %242 = vrot.lane.b32.xlu2 %v239_v57, %s1354_s7  ;;  %v307_v59 = vadd.f32 %v306_v58, %v1487_v19  ;;  %v240_v3 = vmul.f32 %v239_v57, %v1497_v28 }
 0x2ec   :  { %314 = vrot.lane.b32.xlu0 %v307_v59, %s1354_s7 }
 0x2f2   :  { %309 = vrot.lane.b32.xlu2 %v1251_v60, %s1355_s26 }
 0x344   :  { %v243_v61 = vpop.permute.xlu2 %242 }
 0x345   :  { %v245_v62 = vmul.f32 %v243_v61, %v239_v57 }
 0x347   :  { %247 = vrot.lane.b32.xlu1 %v245_v62, %s1355_s26 }
 0x34c   :  { %v310_v11 = vpop.permute.xlu2 %309 }
 0x34d   :  { %v312_v12 = vmul.f32 %v310_v11, %v307_v59 }
 0x35e   :  { %v315_v63 = vpop.permute.xlu0 %314 }
 0x35f   :  { %v317_v1 = vmul.f32 %v315_v63, %v307_v59 }
 0x361   :  { %319 = vrot.lane.b32.xlu0 %v317_v1, %s1355_s26 }
 0x3b9   :  { %v248_v4 = vpop.permute.xlu1 %247 }
 0x3ba   :  { %v1602_v7 = vadd.f32 %v248_v4, %v240_v3  ;;  %v46_v4 = vld [vmem:[%s1873_s0 + $0x18] sm:$0xff] }
 0x3bb   :  { %1245 = vmatmul.msk.f32.gmra.mxu0 %vm57_vm0, %v46_v4 }
 0x3bc   :  { %1297 = vtanh.f32 %v1602_v7 }
 0x3c2   :  { %v1298_v8 = vpop.eup %1297 }
 0x3c3   :  { %253 = vrot.lane.b32.xlu1 %v1298_v8, %s1354_s7 }
 0x3d3   :  { %v320_v13 = vpop.permute.xlu0 %319 }
 0x3d4   :  { %v322_v15 = vadd.f32 %v320_v13, %v312_v12 }
 0x3d6   :  { %1299 = vtanh.f32 %v322_v15 }
 0x3dc   :  { %v1300_v16 = vpop.eup %1299 }
 0x3dd   :  { %325 = vrot.lane.b32.xlu2 %v1300_v16, %s1354_s7 }
 0x435   :  { %v254_v17 = vpop.permute.xlu1 %253 }
 0x436   :  { %v256_v18 = vmul.f32 %v254_v17, %v239_v57 }
 0x437   :  { %v326_v20 = vpop.permute.xlu2 %325 }
 0x438   :  { %v328_v21 = vmul.f32 %v326_v20, %v307_v59  ;;  %337 = vrot.lane.b32.xlu0 %v256_v18, %s1355_s26  ;;  %v108_v11 = vpop.f32.mrf.mxu0 }
 0x439   :  { %v109_v12 = vadd.f32 %v1479_v10, %v108_v11 }
 0x43a   :  { %330 = vrot.lane.b32.xlu1 %v328_v21, %s1355_s26 }
 0x4aa   :  { %v338_v23 = vpop.permute.xlu0 %337 }
 0x4ab   :  { %1256 = vmatmul.msk.f32.vlgmr.msrb.gmra.mxu2 %vm158_vm1, %v338_v23  ;;  %1257 = vmatmul.msk.f32.vlgmr.msrb.gmra.mxu3 %vm158_vm1, %v338_v23 }
 0x4ac   :  { %v331_v24 = vpop.permute.xlu1 %330  ;;  %591 = vmatpush.msrb.mxu2 %v1431_v0  ;;  %633 = vmatpush.msrb.mxu3 %v1504_v30 }
 0x4ad   :  { %333 = vst.msk [vmem:[#allocation3] sm:$0xff] %vm158_vm1, %v331_v24  ;;  %1258 = vmatmul.msk.f32.vlgmr.msra.gmra.mxu1 %vm158_vm1, %v331_v24 }
 0x4ae   :  { %655 = vmatpush.msra.mxu1 %v1533_v36  ;;  %592 = vmatpush.msrb.mxu2 %v1439_v2 }
 0x4af   :  { %634 = vmatpush.msrb.mxu3 %v1509_v31 }
 0x4b0   :  { %656 = vmatpush.msra.mxu1 %v1538_v37  ;;  %593 = vmatpush.msrb.mxu2 %v1451_v5 }
 0x4b1   :  { %635 = vmatpush.msrb.mxu3 %v1515_v32 }
 0x4b2   :  { %657 = vmatpush.msra.mxu1 %v1548_v39  ;;  %594 = vmatpush.msrb.mxu2 %v1459_v6 }
 0x4b3   :  { %636 = vmatpush.msrb.mxu3 %v1521_v33 }
 0x4b4   :  { %658 = vmatpush.msra.mxu1 %v1554_v40 }
 0x52a   :  { %v422_v35 = vpop.f32.mrf.mxu1 }
 0x52e   :  { %v358_v27 = vpop.f32.mrf.mxu2  ;;  %v400_v28 = vpop.f32.mrf.mxu3 }
 0x52f   :  { %v361_v29 = vadd.f32 %v358_v27, %v106_v26  ;;  %v401_v34 = vadd.f32 %v1584_v45, %v400_v28 }
 0x531   :  { %v362_v38 = vmul.f32 %v361_v29, %v1484_v14  ;;  %v425_v41 = vadd.f32 %v422_v35, %v401_v34 }
 0x533   :  { %1301 = vtanh.f32 %v362_v38  ;;  %v426_v42 = vmul.f32 %v425_v41, %v1484_v14 }
 0x535   :  { %1303 = vtanh.f32 %v426_v42 }
 0x539   :  { %v1302_v43 = vpop.eup %1301 }
 0x53a   :  { %v364_v44 = vmul.f32 %v1302_v43, %v1484_v14 }
 0x53b   :  { %v1304_v46 = vpop.eup %1303 }
 0x53c   :  { %v365_v47 = vadd.f32 %v364_v44, %v1487_v19  ;;  %v428_v48 = vmul.f32 %v1304_v46, %v1484_v14 }
 0x53e   :  { %368 = vrot.lane.b32.xlu2 %v365_v47, %s1354_s7  ;;  %v429_v49 = vadd.f32 %v428_v48, %v1487_v19  ;;  %v366_v54 = vmul.f32 %v365_v47, %v1602_v7 }
 0x540   :  { %432 = vrot.lane.b32.xlu0 %v429_v49, %s1354_s7  ;;  %v430_v57 = vmul.f32 %v429_v49, %v322_v15 }
 0x598   :  { %v369_v50 = vpop.permute.xlu2 %368 }
 0x599   :  { %v371_v51 = vmul.f32 %v369_v50, %v365_v47 }
 0x59b   :  { %373 = vrot.lane.b32.xlu1 %v371_v51, %s1355_s26 }
 0x5b2   :  { %v433_v52 = vpop.permute.xlu0 %432 }
 0x5b3   :  { %v435_v53 = vmul.f32 %v433_v52, %v429_v49 }
 0x5b5   :  { %437 = vrot.lane.b32.xlu2 %v435_v53, %s1355_s26 }
 0x60d   :  { %v374_v55 = vpop.permute.xlu1 %373 }
 0x60e   :  { %v1642_v56 = vadd.f32 %v374_v55, %v366_v54  ;;  %v47_v54 = vld [vmem:[%s1873_s0 + $0x20] sm:$0xff] }
 0x60f   :  { %v438_v58 = vpop.permute.xlu2 %437  ;;  %1246 = vmatmul.msk.f32.gmra.mxu0 %vm57_vm0, %v47_v54 }
 0x610   :  { %1305 = vtanh.f32 %v1642_v56  ;;  %v440_v59 = vadd.f32 %v438_v58, %v430_v57 }
 0x612   :  { %1307 = vtanh.f32 %v440_v59 }
 0x616   :  { %v1306_v60 = vpop.eup %1305 }
 0x617   :  { %379 = vrot.lane.b32.xlu0 %v1306_v60, %s1354_s7 }
 0x618   :  { %v1308_v61 = vpop.eup %1307 }
 0x619   :  { %443 = vrot.lane.b32.xlu1 %v1308_v61, %s1354_s7 }
 0x689   :  { %v380_v62 = vpop.permute.xlu0 %379 }
 0x68a   :  { %v382_v63 = vmul.f32 %v380_v62, %v365_v47 }
 0x68b   :  { %v444_v1 = vpop.permute.xlu1 %443 }
 0x68c   :  { %v446_v3 = vmul.f32 %v444_v1, %v429_v49  ;;  %456 = vrot.lane.b32.xlu2 %v382_v63, %s1355_s26  ;;  %v111_v57 = vpop.f32.mrf.mxu0 }
 0x68d   :  { %v112_v58 = vadd.f32 %v1479_v10, %v111_v57 }
 0x68e   :  { %448 = vrot.lane.b32.xlu0 %v446_v3, %s1355_s26 }
 0x6e6   :  { %v457_v7 = vpop.permute.xlu2 %456 }
 0x6e7   :  { %1259 = vmatmul.msk.f32.vlgmr.msra.gmra.mxu2 %vm158_vm1, %v457_v7  ;;  %1260 = vmatmul.msk.f32.vlgmr.msra.gmra.mxu3 %vm158_vm1, %v457_v7 }
 0x6e8   :  { %710 = vmatpush.msra.mxu2 %v1431_v0  ;;  %752 = vmatpush.msra.mxu3 %v1504_v30 }
 0x6ea   :  { %711 = vmatpush.msra.mxu2 %v1439_v2  ;;  %753 = vmatpush.msra.mxu3 %v1509_v31 }
 0x6ec   :  { %712 = vmatpush.msra.mxu2 %v1451_v5  ;;  %754 = vmatpush.msra.mxu3 %v1515_v32 }
 0x6ee   :  { %713 = vmatpush.msra.mxu2 %v1459_v6  ;;  %755 = vmatpush.msra.mxu3 %v1521_v33 }
 0x700   :  { %v449_v8 = vpop.permute.xlu0 %448 }
 0x701   :  { %452 = vst.msk [vmem:[#allocation3 + $0x8] sm:$0xff] %vm158_vm1, %v449_v8  ;;  %1261 = vmatmul.msk.f32.vlgmr.msrb.gmra.mxu1 %vm158_vm1, %v449_v8 }
 0x702   :  { %774 = vmatpush.msrb.mxu1 %v1533_v36 }
 0x704   :  { %775 = vmatpush.msrb.mxu1 %v1538_v37 }
 0x706   :  { %776 = vmatpush.msrb.mxu1 %v1548_v39 }
 0x708   :  { %777 = vmatpush.msrb.mxu1 %v1554_v40 }
 0x76a   :  { %v477_v13 = vpop.f32.mrf.mxu2  ;;  %v519_v21 = vpop.f32.mrf.mxu3 }
 0x76b   :  { %v480_v15 = vadd.f32 %v477_v13, %v109_v12  ;;  %v520_v22 = vadd.f32 %v1584_v45, %v519_v21 }
 0x76d   :  { %v481_v16 = vmul.f32 %v480_v15, %v1484_v14 }
 0x76f   :  { %1309 = vtanh.f32 %v481_v16 }
 0x775   :  { %v1310_v17 = vpop.eup %1309 }
 0x776   :  { %v483_v18 = vmul.f32 %v1310_v17, %v1484_v14 }
 0x778   :  { %v484_v20 = vadd.f32 %v483_v18, %v1487_v19 }
 0x77a   :  { %487 = vrot.lane.b32.xlu1 %v484_v20, %s1354_s7  ;;  %v485_v44 = vmul.f32 %v484_v20, %v1642_v56 }
 0x77e   :  { %v541_v23 = vpop.f32.mrf.mxu1 }
 0x77f   :  { %v544_v24 = vadd.f32 %v541_v23, %v520_v22 }
 0x781   :  { %v545_v25 = vmul.f32 %v544_v24, %v1484_v14 }
 0x783   :  { %1311 = vtanh.f32 %v545_v25 }
 0x789   :  { %v1312_v26 = vpop.eup %1311 }
 0x78a   :  { %v547_v27 = vmul.f32 %v1312_v26, %v1484_v14 }
 0x78c   :  { %v548_v28 = vadd.f32 %v547_v27, %v1487_v19 }
 0x78e   :  { %551 = vrot.lane.b32.xlu2 %v548_v28, %s1354_s7  ;;  %v549_v41 = vmul.f32 %v548_v28, %v440_v59 }
 0x7e8   :  { %v552_v29 = vpop.permute.xlu2 %551 }
 0x7e9   :  { %v554_v34 = vmul.f32 %v552_v29, %v548_v28 }
 0x7eb   :  { %556 = vrot.lane.b32.xlu1 %v554_v34, %s1355_s26 }
 0x7ec   :  { %v488_v35 = vpop.permute.xlu1 %487 }
 0x7ed   :  { %v490_v38 = vmul.f32 %v488_v35, %v484_v20 }
 0x7ef   :  { %492 = vrot.lane.b32.xlu0 %v490_v38, %s1355_s26 }
 0x85d   :  { %v557_v42 = vpop.permute.xlu1 %556 }
 0x85e   :  { %v1681_v43 = vadd.f32 %v557_v42, %v549_v41  ;;  %v48_v41 = vld [vmem:[%s1873_s0 + $0x28] sm:$0xff] }
 0x85f   :  { %1247 = vmatmul.msk.f32.gmra.mxu0 %vm57_vm0, %v48_v41 }
 0x860   :  { %1313 = vtanh.f32 %v1681_v43 }
 0x861   :  { %v493_v46 = vpop.permute.xlu0 %492 }
 0x862   :  { %v495_v47 = vadd.f32 %v493_v46, %v485_v44 }
 0x864   :  { %1315 = vtanh.f32 %v495_v47 }
 0x866   :  { %v1314_v48 = vpop.eup %1313 }
 0x867   :  { %562 = vrot.lane.b32.xlu0 %v1314_v48, %s1354_s7 }
 0x86a   :  { %v1316_v49 = vpop.eup %1315 }
 0x86b   :  { %498 = vrot.lane.b32.xlu2 %v1316_v49, %s1354_s7 }
 0x8c5   :  { %v499_v50 = vpop.permute.xlu2 %498 }
 0x8c6   :  { %v501_v51 = vmul.f32 %v499_v50, %v484_v20 }
 0x8c8   :  { %575 = vrot.lane.b32.xlu1 %v501_v51, %s1355_s26 }
 0x8d9   :  { %v563_v52 = vpop.permute.xlu0 %562 }
 0x8da   :  { %v565_v53 = vmul.f32 %v563_v52, %v548_v28 }
 0x8dc   :  { %567 = vrot.lane.b32.xlu2 %v565_v53, %s1355_s26 }
 0x936   :  { %v568_v55 = vpop.permute.xlu2 %567 }
 0x937   :  { %571 = vst.msk [vmem:[#allocation3 + $0x10] sm:$0xff] %vm158_vm1, %v568_v55  ;;  %1264 = vmatmul.msk.f32.vlgmr.msra.gmra.mxu1 %vm158_vm1, %v568_v55 }
 0x938   :  { %893 = vmatpush.msra.mxu1 %v1533_v36 }
 0x93a   :  { %v576_v56 = vpop.permute.xlu1 %575  ;;  %894 = vmatpush.msra.mxu1 %v1538_v37 }
 0x93b   :  { %1262 = vmatmul.msk.f32.vlgmr.msrb.gmra.mxu2 %vm158_vm1, %v576_v56  ;;  %1263 = vmatmul.msk.f32.vlgmr.msrb.gmra.mxu3 %vm158_vm1, %v576_v56 }
 0x93c   :  { %829 = vmatpush.msrb.mxu2 %v1431_v0  ;;  %871 = vmatpush.msrb.mxu3 %v1504_v30 }
 0x93d   :  { %895 = vmatpush.msra.mxu1 %v1548_v39 }
 0x93e   :  { %830 = vmatpush.msrb.mxu2 %v1439_v2  ;;  %872 = vmatpush.msrb.mxu3 %v1509_v31 }
 0x93f   :  { %896 = vmatpush.msra.mxu1 %v1554_v40 }
 0x940   :  { %831 = vmatpush.msrb.mxu2 %v1451_v5  ;;  %873 = vmatpush.msrb.mxu3 %v1515_v32 }
 0x942   :  { %832 = vmatpush.msrb.mxu2 %v1459_v6  ;;  %874 = vmatpush.msrb.mxu3 %v1521_v33 }
 0x9b4   :  { %v660_v63 = vpop.f32.mrf.mxu1 }
 0x9be   :  { %v596_v59 = vpop.f32.mrf.mxu2  ;;  %v638_v60 = vpop.f32.mrf.mxu3 }
 0x9bf   :  { %v599_v61 = vadd.f32 %v596_v59, %v112_v58  ;;  %v639_v62 = vadd.f32 %v1584_v45, %v638_v60 }
 0x9c1   :  { %v600_v1 = vmul.f32 %v599_v61, %v1484_v14  ;;  %v663_v3 = vadd.f32 %v660_v63, %v639_v62 }
 0x9c3   :  { %1317 = vtanh.f32 %v600_v1  ;;  %v664_v4 = vmul.f32 %v663_v3, %v1484_v14 }
 0x9c5   :  { %1319 = vtanh.f32 %v664_v4 }
 0x9c9   :  { %v1318_v7 = vpop.eup %1317 }
 0x9ca   :  { %v602_v8 = vmul.f32 %v1318_v7, %v1484_v14 }
 0x9cb   :  { %v1320_v11 = vpop.eup %1319 }
 0x9cc   :  { %v603_v12 = vadd.f32 %v602_v8, %v1487_v19  ;;  %v666_v13 = vmul.f32 %v1320_v11, %v1484_v14 }
 0x9ce   :  { %606 = vrot.lane.b32.xlu0 %v603_v12, %s1354_s7  ;;  %v667_v15 = vadd.f32 %v666_v13, %v1487_v19  ;;  %v604_v21 = vmul.f32 %v603_v12, %v495_v47 }
 0x9d0   :  { %670 = vrot.lane.b32.xlu1 %v667_v15, %s1354_s7  ;;  %v668_v25 = vmul.f32 %v667_v15, %v1681_v43 }
 0xa40   :  { %v607_v16 = vpop.permute.xlu0 %606 }
 0xa41   :  { %v609_v17 = vmul.f32 %v607_v16, %v603_v12  ;;  %v49_v16 = vld [vmem:[%s1873_s0 + $0x30] sm:$0xff] }
 0xa42   :  { %v671_v18 = vpop.permute.xlu1 %670  ;;  %1248 = vmatmul.msk.f32.gmra.mxu0 %vm57_vm0, %v49_v16 }
 0xa43   :  { %v673_v20 = vmul.f32 %v671_v18, %v667_v15  ;;  %611 = vrot.lane.b32.xlu2 %v609_v17, %s1355_s26 }
 0xa45   :  { %675 = vrot.lane.b32.xlu0 %v673_v20, %s1355_s26 }
 0xa9d   :  { %v612_v22 = vpop.permute.xlu2 %611 }
 0xa9e   :  { %v614_v23 = vadd.f32 %v612_v22, %v604_v21 }
 0xaa0   :  { %1321 = vtanh.f32 %v614_v23 }
 0xaa6   :  { %v1322_v24 = vpop.eup %1321 }
 0xaa7   :  { %617 = vrot.lane.b32.xlu1 %v1322_v24, %s1354_s7 }
 0xab7   :  { %v676_v26 = vpop.permute.xlu0 %675 }
 0xab8   :  { %v678_v27 = vadd.f32 %v676_v26, %v668_v25 }
 0xaba   :  { %1323 = vtanh.f32 %v678_v27 }
 0xac0   :  { %v1324_v28 = vpop.eup %1323 }
 0xac1   :  { %681 = vrot.lane.b32.xlu2 %v1324_v28, %s1354_s7 }
 0xb19   :  { %v618_v29 = vpop.permute.xlu1 %617 }
 0xb1a   :  { %v620_v34 = vmul.f32 %v618_v29, %v603_v12 }
 0xb1b   :  { %v682_v35 = vpop.permute.xlu2 %681 }
 0xb1c   :  { %v684_v38 = vmul.f32 %v682_v35, %v667_v15  ;;  %694 = vrot.lane.b32.xlu0 %v620_v34, %s1355_s26 }
 0xb1e   :  { %686 = vrot.lane.b32.xlu1 %v684_v38, %s1355_s26 }
 0xb8e   :  { %v695_v42 = vpop.permute.xlu0 %694 }
 0xb8f   :  { %1265 = vmatmul.msk.f32.vlgmr.msra.gmra.mxu2 %vm158_vm1, %v695_v42  ;;  %1266 = vmatmul.msk.f32.vlgmr.msra.gmra.mxu3 %vm158_vm1, %v695_v42 }
 0xb90   :  { %v687_v43 = vpop.permute.xlu1 %686  ;;  %948 = vmatpush.msra.mxu2 %v1431_v0  ;;  %990 = vmatpush.msra.mxu3 %v1504_v30  ;;  %v114_v0 = vpop.f32.mrf.mxu0 }
 0xb91   :  { %690 = vst.msk [vmem:[#allocation3 + $0x18] sm:$0xff] %vm158_vm1, %v687_v43  ;;  %1267 = vmatmul.msk.f32.vlgmr.msrb.gmra.mxu1 %vm158_vm1, %v687_v43  ;;  %v115_v44 = vadd.f32 %v1479_v10, %v114_v0 }
 0xb92   :  { %1012 = vmatpush.msrb.mxu1 %v1533_v36  ;;  %949 = vmatpush.msra.mxu2 %v1439_v2 }
 0xb93   :  { %991 = vmatpush.msra.mxu3 %v1509_v31 }
 0xb94   :  { %1013 = vmatpush.msrb.mxu1 %v1538_v37  ;;  %950 = vmatpush.msra.mxu2 %v1451_v5 }
 0xb95   :  { %992 = vmatpush.msra.mxu3 %v1515_v32 }
 0xb96   :  { %1014 = vmatpush.msrb.mxu1 %v1548_v39  ;;  %951 = vmatpush.msra.mxu2 %v1459_v6 }
 0xb97   :  { %993 = vmatpush.msra.mxu3 %v1521_v33 }
 0xb98   :  { %1015 = vmatpush.msrb.mxu1 %v1554_v40 }
 0xc0e   :  { %v779_v49 = vpop.f32.mrf.mxu1 }
 0xc12   :  { %v715_v2 = vpop.f32.mrf.mxu2  ;;  %v757_v46 = vpop.f32.mrf.mxu3 }
 0xc13   :  { %v718_v47 = vadd.f32 %v715_v2, %v115_v44  ;;  %v758_v48 = vadd.f32 %v1584_v45, %v757_v46 }
 0xc15   :  { %v719_v5 = vmul.f32 %v718_v47, %v1484_v14  ;;  %v782_v50 = vadd.f32 %v779_v49, %v758_v48 }
 0xc17   :  { %1325 = vtanh.f32 %v719_v5  ;;  %v783_v51 = vmul.f32 %v782_v50, %v1484_v14  ;;  %v50_v50 = vld [vmem:[%s1873_s0 + $0x38] sm:$0xff] }
 0xc18   :  { %1249 = vmatmul.msk.f32.gmra.mxu0 %vm57_vm0, %v50_v50 }
 0xc19   :  { %1327 = vtanh.f32 %v783_v51 }
 0xc1d   :  { %v1326_v6 = vpop.eup %1325 }
 0xc1e   :  { %v721_v52 = vmul.f32 %v1326_v6, %v1484_v14 }
 0xc1f   :  { %v1328_v53 = vpop.eup %1327 }
 0xc20   :  { %v722_v54 = vadd.f32 %v721_v52, %v1487_v19  ;;  %v785_v55 = vmul.f32 %v1328_v53, %v1484_v14 }
 0xc22   :  { %725 = vrot.lane.b32.xlu2 %v722_v54, %s1354_s7  ;;  %v786_v56 = vadd.f32 %v785_v55, %v1487_v19  ;;  %v723_v61 = vmul.f32 %v722_v54, %v614_v23 }
 0xc24   :  { %789 = vrot.lane.b32.xlu0 %v786_v56, %s1354_s7  ;;  %v787_v1 = vmul.f32 %v786_v56, %v678_v27 }
 0xc7c   :  { %v726_v57 = vpop.permute.xlu2 %725 }
 0xc7d   :  { %v728_v58 = vmul.f32 %v726_v57, %v722_v54 }
 0xc7f   :  { %730 = vrot.lane.b32.xlu1 %v728_v58, %s1355_s26 }
 0xc96   :  { %v790_v59 = vpop.permute.xlu0 %789 }
 0xc97   :  { %v792_v60 = vmul.f32 %v790_v59, %v786_v56 }
 0xc99   :  { %794 = vrot.lane.b32.xlu2 %v792_v60, %s1355_s26 }
 0xcf1   :  { %v731_v62 = vpop.permute.xlu1 %730 }
 0xcf2   :  { %v733_v63 = vadd.f32 %v731_v62, %v723_v61 }
 0xcf3   :  { %v795_v3 = vpop.permute.xlu2 %794 }
 0xcf4   :  { %1329 = vtanh.f32 %v733_v63  ;;  %v797_v4 = vadd.f32 %v795_v3, %v787_v1 }
 0xcf6   :  { %1331 = vtanh.f32 %v797_v4 }
 0xcfa   :  { %v1330_v7 = vpop.eup %1329 }
 0xcfb   :  { %736 = vrot.lane.b32.xlu0 %v1330_v7, %s1354_s7 }
 0xcfc   :  { %v1332_v8 = vpop.eup %1331 }
 0xcfd   :  { %800 = vrot.lane.b32.xlu1 %v1332_v8, %s1354_s7 }
 0xd6d   :  { %v737_v11 = vpop.permute.xlu0 %736 }
 0xd6e   :  { %v739_v12 = vmul.f32 %v737_v11, %v722_v54 }
 0xd6f   :  { %v801_v13 = vpop.permute.xlu1 %800 }
 0xd70   :  { %v803_v15 = vmul.f32 %v801_v13, %v786_v56  ;;  %813 = vrot.lane.b32.xlu2 %v739_v12, %s1355_s26 }
 0xd72   :  { %805 = vrot.lane.b32.xlu0 %v803_v15, %s1355_s26 }
 0xdca   :  { %v814_v17 = vpop.permute.xlu2 %813 }
 0xdcb   :  { %1268 = vmatmul.msk.f32.vlgmr.msrb.gmra.mxu2 %vm158_vm1, %v814_v17  ;;  %1269 = vmatmul.msk.f32.vlgmr.msrb.gmra.mxu3 %vm158_vm1, %v814_v17 }
 0xdcc   :  { %1065 = vmatpush.msrb.mxu2 %v1504_v30  ;;  %1087 = vmatpush.msrb.mxu3 %v1533_v36  ;;  %v117_v30 = vpop.f32.mrf.mxu0 }
 0xdcd   :  { %v118_v36 = vadd.f32 %v1479_v10, %v117_v30 }
 0xdce   :  { %1066 = vmatpush.msrb.mxu2 %v1509_v31  ;;  %1088 = vmatpush.msrb.mxu3 %v1538_v37 }
 0xdd0   :  { %1067 = vmatpush.msrb.mxu2 %v1515_v32  ;;  %1089 = vmatpush.msrb.mxu3 %v1548_v39 }
 0xdd2   :  { %1068 = vmatpush.msrb.mxu2 %v1521_v33  ;;  %1090 = vmatpush.msrb.mxu3 %v1554_v40 }
 0xdd4   :  { %v120_v52 = vpop.f32.mrf.mxu0 }
 0xdd5   :  { %v121_v53 = vadd.f32 %v1479_v10, %v120_v52 }
 0xde4   :  { %v806_v18 = vpop.permute.xlu0 %805 }
 0xde5   :  { %809 = vst.msk [vmem:[#allocation3 + $0x20] sm:$0xff] %vm158_vm1, %v806_v18  ;;  %1270 = vmatmul.msk.f32.vlgmr.msra.gmra.mxu1 %vm158_vm1, %v806_v18 }
 0xe4e   :  { %v834_v20 = vpop.f32.mrf.mxu2  ;;  %v876_v21 = vpop.f32.mrf.mxu3 }
 0xe4f   :  { %v837_v31 = vadd.f32 %v834_v20, %v118_v36  ;;  %v877_v40 = vadd.f32 %v1584_v45, %v876_v21 }
 0xe51   :  { %v838_v37 = vmul.f32 %v837_v31, %v1484_v14 }
 0xe53   :  { %1333 = vtanh.f32 %v838_v37 }
 0xe59   :  { %v1334_v32 = vpop.eup %1333 }
 0xe5a   :  { %v840_v39 = vmul.f32 %v1334_v32, %v1484_v14 }
 0xe5c   :  { %v841_v33 = vadd.f32 %v840_v39, %v1487_v19 }
 0xe5e   :  { %844 = vrot.lane.b32.xlu1 %v841_v33, %s1354_s7  ;;  %v842_v43 = vmul.f32 %v841_v33, %v733_v63 }
 0xe62   :  { %v898_v22 = vpop.f32.mrf.mxu1 }
 0xe63   :  { %v901_v23 = vadd.f32 %v898_v22, %v877_v40 }
 0xe65   :  { %v902_v24 = vmul.f32 %v901_v23, %v1484_v14 }
 0xe67   :  { %1335 = vtanh.f32 %v902_v24 }
 0xe6d   :  { %v1336_v25 = vpop.eup %1335 }
 0xe6e   :  { %v904_v26 = vmul.f32 %v1336_v25, %v1484_v14 }
 0xe70   :  { %v905_v27 = vadd.f32 %v904_v26, %v1487_v19 }
 0xe72   :  { %908 = vrot.lane.b32.xlu2 %v905_v27, %s1354_s7  ;;  %v906_v38 = vmul.f32 %v905_v27, %v797_v4 }
 0xecc   :  { %v909_v28 = vpop.permute.xlu2 %908 }
 0xecd   :  { %v911_v29 = vmul.f32 %v909_v28, %v905_v27 }
 0xecf   :  { %913 = vrot.lane.b32.xlu1 %v911_v29, %s1355_s26 }
 0xed0   :  { %v845_v34 = vpop.permute.xlu1 %844 }
 0xed1   :  { %v847_v35 = vmul.f32 %v845_v34, %v841_v33 }
 0xed3   :  { %849 = vrot.lane.b32.xlu0 %v847_v35, %s1355_s26  ;;  %v1139_v35 = vld [vmem:[#allocation3 + $0x8] sm:$0xff] }
 0xf41   :  { %v914_v41 = vpop.permute.xlu1 %913 }
 0xf42   :  { %v916_v42 = vadd.f32 %v914_v41, %v906_v38 }
 0xf44   :  { %1337 = vtanh.f32 %v916_v42 }
 0xf45   :  { %v850_v0 = vpop.permute.xlu0 %849 }
 0xf46   :  { %v852_v44 = vadd.f32 %v850_v0, %v842_v43 }
 0xf48   :  { %1339 = vtanh.f32 %v852_v44 }
 0xf4a   :  { %v1338_v2 = vpop.eup %1337 }
 0xf4b   :  { %919 = vrot.lane.b32.xlu0 %v1338_v2, %s1354_s7 }
 0xf4e   :  { %v1340_v46 = vpop.eup %1339 }
 0xf4f   :  { %855 = vrot.lane.b32.xlu2 %v1340_v46, %s1354_s7 }
 0xfa9   :  { %v856_v47 = vpop.permute.xlu2 %855 }
 0xfaa   :  { %v858_v48 = vmul.f32 %v856_v47, %v841_v33 }
 0xfac   :  { %932 = vrot.lane.b32.xlu1 %v858_v48, %s1355_s26 }
 0xfbd   :  { %v920_v49 = vpop.permute.xlu0 %919 }
 0xfbe   :  { %v922_v5 = vmul.f32 %v920_v49, %v905_v27 }
 0xfc0   :  { %924 = vrot.lane.b32.xlu2 %v922_v5, %s1355_s26  ;;  %v1140_v5 = vld [vmem:[#allocation3 + $0x10] sm:$0xff] }
0x101a   :  { %v925_v51 = vpop.permute.xlu2 %924 }
0x101b   :  { %928 = vst.msk [vmem:[#allocation3 + $0x28] sm:$0xff] %vm158_vm1, %v925_v51  ;;  %1273 = vmatmul.msk.f32.vlgmr.msrb.gmra.mxu1 %vm158_vm1, %v925_v51 }
0x101e   :  { %v933_v6 = vpop.permute.xlu1 %932 }
0x101f   :  { %1271 = vmatmul.msk.f32.vlgmr.msra.gmra.mxu2 %vm158_vm1, %v933_v6  ;;  %1272 = vmatmul.msk.f32.vlgmr.msra.gmra.mxu3 %vm158_vm1, %v933_v6  ;;  %v1142_v6 = vld [vmem:[#allocation3 + $0x20] sm:$0xff] }
0x1022   :  { %v1143_v43 = vld [vmem:[#allocation3 + $0x28] sm:$0xff] }
0x1098   :  { %v1017_v58 = vpop.f32.mrf.mxu1 }
0x10a2   :  { %v953_v54 = vpop.f32.mrf.mxu2  ;;  %v995_v55 = vpop.f32.mrf.mxu3 }
0x10a3   :  { %v956_v56 = vadd.f32 %v953_v54, %v121_v53  ;;  %v996_v57 = vadd.f32 %v1584_v45, %v995_v55 }
0x10a5   :  { %v957_v59 = vmul.f32 %v956_v56, %v1484_v14  ;;  %v1020_v60 = vadd.f32 %v1017_v58, %v996_v57 }
0x10a7   :  { %1341 = vtanh.f32 %v957_v59  ;;  %v1021_v61 = vmul.f32 %v1020_v60, %v1484_v14  ;;  %v19_v60 = vstv %s1883_s4 }
0x10a8   :  { %20 = vst [vmem:[#allocation4] sm:$0x1] %v19_v60 }
0x10a9   :  { %1343 = vtanh.f32 %v1021_v61  ;;  %v1357_v61 = vmov 0  }
0x10aa   :  { %1283 = vset.pattern.permute.xlu2 %v1357_v61  ;;  %1284 = vset.pattern.permute.xlu0 %v1357_v61 }
0x10ad   :  { %v1342_v62 = vpop.eup %1341 }
0x10ae   :  { %v959_v63 = vmul.f32 %v1342_v62, %v1484_v14  ;;  %v1138_v62 = vld [vmem:[#allocation3] sm:$0xff] }
0x10af   :  { %v1344_v1 = vpop.eup %1343 }
0x10b0   :  { %v960_v3 = vadd.f32 %v959_v63, %v1487_v19  ;;  %v1023_v10 = vmul.f32 %v1344_v1, %v1484_v14 }
0x10b2   :  { %963 = vrot.lane.b32.xlu0 %v960_v3, %s1354_s7  ;;  %v1024_v4 = vadd.f32 %v1023_v10, %v1487_v19  ;;  %v961_v13 = vmul.f32 %v960_v3, %v852_v44 }
0x10b4   :  { %1027 = vrot.lane.b32.xlu1 %v1024_v4, %s1354_s7  ;;  %v1025_v18 = vmul.f32 %v1024_v4, %v916_v42 }
0x1124   :  { %v964_v7 = vpop.permute.xlu0 %963 }
0x1125   :  { %v966_v8 = vmul.f32 %v964_v7, %v960_v3 }
0x1126   :  { %v1028_v11 = vpop.permute.xlu1 %1027 }
0x1127   :  { %v1030_v12 = vmul.f32 %v1028_v11, %v1024_v4  ;;  %968 = vrot.lane.b32.xlu2 %v966_v8, %s1355_s26 }
0x1129   :  { %1032 = vrot.lane.b32.xlu0 %v1030_v12, %s1355_s26 }
0x1181   :  { %v969_v15 = vpop.permute.xlu2 %968 }
0x1182   :  { %v971_v16 = vadd.f32 %v969_v15, %v961_v13 }
0x1184   :  { %1345 = vtanh.f32 %v971_v16 }
0x118a   :  { %v1346_v17 = vpop.eup %1345 }
0x118b   :  { %974 = vrot.lane.b32.xlu1 %v1346_v17, %s1354_s7 }
0x119b   :  { %v1033_v30 = vpop.permute.xlu0 %1032 }
0x119c   :  { %v1035_v36 = vadd.f32 %v1033_v30, %v1025_v18 }
0x119e   :  { %1347 = vtanh.f32 %v1035_v36 }
0x11a4   :  { %v1348_v20 = vpop.eup %1347 }
0x11a5   :  { %1038 = vrot.lane.b32.xlu2 %v1348_v20, %s1354_s7 }
0x11fd   :  { %v975_v31 = vpop.permute.xlu1 %974 }
0x11fe   :  { %v977_v37 = vmul.f32 %v975_v31, %v960_v3  ;;  %v1288_v3 = vld [vmem:[#allocation4] ss:$0 sm:$0xff] }
0x11ff   :  { %v1039_v32 = vpop.permute.xlu2 %1038 }
0x1200   :  { %v1041_v39 = vmul.f32 %v1039_v32, %v1024_v4  ;;  %1049 = vrot.lane.b32.xlu0 %v977_v37, %s1355_s26 }
0x1202   :  { %1043 = vrot.lane.b32.xlu1 %v1041_v39, %s1355_s26 }
0x1272   :  { %v1050_v33 = vpop.permute.xlu0 %1049 }
0x1273   :  { %1124 = vst.msk [vmem:[%s1881_s12] sm:$0xff] %vm158_vm1, %v1050_v33  ;;  %1274 = vmatmul.msk.f32.vlgmr.msrb.gmra.mxu2 %vm158_vm1, %v1050_v33 }
0x1274   :  { %v1044_v21 = vpop.permute.xlu1 %1043 }
0x1275   :  { %1047 = vst.msk [vmem:[#allocation3 + $0x30] sm:$0xff] %vm158_vm1, %v1044_v21  ;;  %1275 = vmatmul.msk.f32.vlgmr.msrb.gmra.mxu3 %vm158_vm1, %v1044_v21 }
0x127c   :  { %v1144_v54 = vld [vmem:[#allocation3 + $0x30] sm:$0xff] }
0x12f6   :  { %v1070_v40 = vpop.f32.mrf.mxu2 }
0x12f7   :  { %v1071_v22 = vadd.f32 %v1584_v45, %v1070_v40  ;;  %v1287_v45 = vld [vmem:[%s1880_s3] ss:$0 sm:$0xff] }
0x12f8   :  { %v1092_v23 = vpop.f32.mrf.mxu3  ;;  %v1151_v38 = vmul.f32 %v1287_v45, %v1139_v35  ;;  %v1155_v0 = vmul.f32 %v1287_v45, %v1143_v43  ;;  %v1152_v50 = vmul.f32 %v1287_v45, %v1140_v5  ;;  %v1154_v52 = vmul.f32 %v1287_v45, %v1142_v6 }
0x12f9   :  { %v1095_v24 = vadd.f32 %v1092_v23, %v1071_v22  ;;  %v1156_v55 = vmul.f32 %v1287_v45, %v1144_v54  ;;  %v1150_v63 = vmul.f32 %v1287_v45, %v1138_v62 }
0x12fa   :  { %v1161_v41 = vsel %vm158_vm1, %v1151_v38, 0.0  ;;  %v1173_v44 = vsel %vm158_vm1, %v1155_v0, 0.0  ;;  %v1164_v51 = vsel %vm158_vm1, %v1152_v50, 0.0  ;;  %v1170_v53 = vsel %vm158_vm1, %v1154_v52, 0.0 }
0x12fb   :  { %v1096_v25 = vmul.f32 %v1095_v24, %v1484_v14  ;;  %v1176_v56 = vsel %vm158_vm1, %v1156_v55, 0.0  ;;  %v1158_v1 = vsel %vm158_vm1, %v1150_v63, 0.0 }
0x12fd   :  { %1349 = vtanh.f32 %v1096_v25 }
0x1303   :  { %v1350_v26 = vpop.eup %1349 }
0x1304   :  { %v1098_v27 = vmul.f32 %v1350_v26, %v1484_v14  ;;  %v1141_v14 = vld [vmem:[#allocation3 + $0x18] sm:$0xff] }
0x1305   :  { %v1153_v42 = vmul.f32 %v1287_v45, %v1141_v14 }
0x1306   :  { %v1099_v28 = vadd.f32 %v1098_v27, %v1487_v19 }
0x1307   :  { %v1167_v19 = vsel %vm158_vm1, %v1153_v42, 0.0 }
0x1308   :  { %1102 = vrot.lane.b32.xlu2 %v1099_v28, %s1354_s7  ;;  %v1100_v2 = vmul.f32 %v1099_v28, %v1035_v36 }
0x1362   :  { %v1103_v29 = vpop.permute.xlu2 %1102 }
0x1363   :  { %v1105_v34 = vmul.f32 %v1103_v29, %v1099_v28 }
0x1365   :  { %1107 = vrot.lane.b32.xlu0 %v1105_v34, %s1355_s26 }
0x136d   :  { %1126 = vrot.lane.b32.xlu0 %v971_v16, %s1356_s22 }
0x1397   :  { %1162 = vadd.xlane.f32.xlu0 %v1161_v41 }
0x139f   :  { %1168 = vadd.xlane.f32.xlu0 %v1167_v19 }
0x13a7   :  { %1174 = vadd.xlane.f32.xlu0 %v1173_v44 }
0x13d7   :  { %v1108_v46 = vpop.permute.xlu0 %1107 }
0x13d8   :  { %v1110_v47 = vadd.f32 %v1108_v46, %v1100_v2 }
0x13da   :  { %1351 = vtanh.f32 %v1110_v47 }
0x13df   :  { %v1127_v48 = vpop.permute.xlu0 %1126 }
0x13e0   :  { %v1352_v49 = vpop.eup %1351  ;;  %1129 = vst.msk [vmem:[%s1882_s13] sm:$0xff] %vm158_vm1, %v1127_v48 }
0x13e1   :  { %1113 = vrot.lane.b32.xlu1 %v1352_v49, %s1354_s7 }
0x13e9   :  { %1133 = vrot.lane.b32.xlu1 %v1110_v47, %s1356_s22 }
0x140a   :  { %v1163_v12 = vpop.xlane.xlu0 %1162 }
0x1412   :  { %v1169_v18 = vpop.xlane.xlu0 %1168 }
0x1413   :  { %1165 = vadd.xlane.f32.xlu1 %v1164_v51 }
0x141a   :  { %v1175_v22 = vpop.xlane.xlu0 %1174 }
0x141b   :  { %1171 = vadd.xlane.f32.xlu1 %v1170_v53 }
0x1423   :  { %1177 = vadd.xlane.f32.xlu1 %v1176_v56 }
0x1453   :  { %v1114_v57 = vpop.permute.xlu1 %1113 }
0x1454   :  { %v1116_v58 = vmul.f32 %v1114_v57, %v1099_v28 }
0x1456   :  { %1118 = vrot.lane.b32.xlu2 %v1116_v58, %s1355_s26 }
0x145b   :  { %v1134_v59 = vpop.permute.xlu1 %1133 }
0x145c   :  { %1277 = vst.msk [vmem:[%s1882_s13 + $0x8] sm:$0xff] %vm158_vm1, %v1134_v59 }
0x147f   :  { %1159 = vadd.xlane.f32.xlu2 %v1158_v1 }
0x1486   :  { %v1166_v13 = vpop.xlane.xlu1 %1165 }
0x148e   :  { %v1172_v31 = vpop.xlane.xlu1 %1171 }
0x1496   :  { %v1178_v26 = vpop.xlane.xlu1 %1177 }
0x1497   :  { %1186 = vperm.xlu2 %1283, %v1288_v3  }
0x14b0   :  { %v1119_v10 = vpop.permute.xlu2 %1118 }
0x14b1   :  { %1122 = vst.msk [vmem:[#allocation3 + $0x38] sm:$0xff] %vm158_vm1, %v1119_v10 }
0x14b2   :  { %1276 = vst.msk [vmem:[%s1881_s12 + $0x8] sm:$0xff] %vm158_vm1, %v1119_v10 }
0x14b8   :  { %v1145_v4 = vld [vmem:[#allocation3 + $0x38] sm:$0xff] }
0x14b9   :  { %v1157_v7 = vmul.f32 %v1287_v45, %v1145_v4 }
0x14bb   :  { %v1179_v8 = vsel %vm158_vm1, %v1157_v7, 0.0 }
0x14c0   :  { %1180 = vadd.xlane.f32.xlu2 %v1179_v8 }
0x14f2   :  { %v1160_v11 = vpop.xlane.xlu2 %1159 }
0x14fa   :  { %v1187_v15 = vpop.permute.xlu2 %1186 }
0x14fb   :  { %v1189_v16 = vadd.f32 %v1187_v15, %v1160_v11  ;;  %v1190_v17 = vadd.f32 %v1187_v15, %v1163_v12  ;;  %v1191_v30 = vadd.f32 %v1187_v15, %v1166_v13  ;;  %v1192_v32 = vadd.f32 %v1187_v15, %v1169_v18 }
0x14fc   :  { %v1193_v33 = vadd.f32 %v1187_v15, %v1172_v31  ;;  %v1194_v23 = vadd.f32 %v1187_v15, %v1175_v22  ;;  %v1195_v27 = vadd.f32 %v1187_v15, %v1178_v26 }
0x14fd   :  { %v1205_v36 = vperm.slane %v1189_v16, %v1474_v9  ;;  %v1206_v20 = vperm.slane %v1190_v17, %v1474_v9  ;;  %v1207_v37 = vperm.slane %v1191_v30, %v1474_v9  ;;  %v1208_v40 = vperm.slane %v1192_v32, %v1474_v9 }
0x14fe   :  { %v1209_v25 = vperm.slane %v1193_v33, %v1474_v9  ;;  %v1210_v29 = vperm.slane %v1194_v23, %v1474_v9  ;;  %v1211_v38 = vperm.slane %v1195_v27, %v1474_v9 }
0x14ff   :  { %v1214_v39 = vsel %vm1213_vm5, %v1206_v20, %v1205_v36 }
0x1500   :  { %v1216_v21 = vsel %vm1215_vm6, %v1207_v37, %v1214_v39 }
0x1501   :  { %v1218_v24 = vsel %vm1217_vm7, %v1208_v40, %v1216_v21 }
0x1502   :  { %v1220_v28 = vsel %vm1219_vm8, %v1209_v25, %v1218_v24 }
0x1503   :  { %v1222_v45 = vsel %vm1221_vm9, %v1210_v29, %v1220_v28 }
0x1504   :  { %v1224_v14 = vsel %vm1223_vm10, %v1211_v38, %v1222_v45 }
0x1533   :  { %v1181_v34 = vpop.xlane.xlu2 %1180 }
0x1534   :  { %v1196_v35 = vadd.f32 %v1187_v15, %v1181_v34 }
0x1536   :  { %v1212_v41 = vperm.slane %v1196_v35, %v1474_v9 }
0x1538   :  { %v1226_v42 = vsel %vm1225_vm11, %v1212_v41, %v1224_v14 }
0x1539   :  { %1229 = vst.msk [vmem:[%s1884_s11] sm:$0xff] %vm1228_vm12, %v1226_v42 }

</bundles_post_ra>
